<compile_context>
chip_gen: v7x
topology: tpu7x:2x2x1
jax: 0.10.0
libtpu: 0.0.40
codegen_flags: <defaults>
</compile_context>

<pallas_src>
import jax
import jax.numpy as jnp
from jax.experimental import pallas as pl
from jax.experimental.pallas import tpu as pltpu


def _cond_gru_kernel(
    h0_ref,        # (Bp, Hp)        initial hidden state (constant across grid)
    gi_ref,        # (Tc, Bp, 3Hp)   pre-projected input gates (time chunk)
    whh_t_ref,     # (Hp, 3Hp)       concatenated hidden weights, transposed
    bhn_ref,       # (1, Hp)         hidden bias of the n-gate (kept separate)
    wfc_t_ref,     # (Hp, Dout)      fc weight, transposed
    bfc_ref,       # (1, Dout)       fc bias
    out_ref,       # (Tc, Bp, Dout)  output chunk
    h_ref,         # (Bp, Hp) f32    hidden-state carry (VMEM scratch)
    hs_ref,        # (Tc, Bp, Hp)    per-chunk hidden states (VMEM scratch)
):
    Tc, Bp, _ = gi_ref.shape
    Hp = h_ref.shape[1]
    Dout = out_ref.shape[2]

    # Initialize the carried hidden state on the first time chunk only.
    @pl.when(pl.program_id(0) == 0)
    def _():
        h_ref[...] = h0_ref[...].astype(jnp.float32)

    # Hoisted (1,Hp)->(Bp,Hp) broadcast of the n-gate hidden bias: JAX does not
    # CSE broadcast_in_dim, so leaving it inside the unrolled loop re-emits it
    # every timestep.
    bhn = jnp.broadcast_to(bhn_ref[...], (Bp, Hp)).astype(jnp.float32)

    def step(t, h):
        gi = gi_ref[t].astype(jnp.float32)                       # (Bp, 3Hp)
        # Single fused hidden matmul for all three gates (f32 accumulation).
        gh = jnp.dot(h.astype(whh_t_ref.dtype), whh_t_ref[...],
                     preferred_element_type=jnp.float32)          # (Bp, 3Hp)
        # Gate slices are 128-lane aligned (Hp is a multiple of 128).
        # r/z input-side slices already include b_ir+b_hr / b_iz+b_hz (folded
        # in the wrapper); b_hn stays inside the r-gating per GRU semantics.
        r = jax.nn.sigmoid(gi[:, :Hp] + gh[:, :Hp])
        z = jax.nn.sigmoid(gi[:, Hp:2 * Hp] + gh[:, Hp:2 * Hp])
        n = jnp.tanh(gi[:, 2 * Hp:] + r * (gh[:, 2 * Hp:] + bhn))
        h_new = (1.0 - z) * n + z * h
        hs_ref[t] = h_new
        return h_new

    h_ref[...] = jax.lax.fori_loop(0, Tc, step, h_ref[...],
                                   unroll=min(8, Tc))

    # Chunk-batched fc head: one (Tc*Bp, Hp) @ (Hp, Dout) matmul and one store
    # per chunk instead of Tc tiny matmuls / masked stores on the serial path.
    hs = hs_ref[...].reshape(Tc * Bp, Hp)
    out = jnp.dot(hs.astype(wfc_t_ref.dtype), wfc_t_ref[...],
                  preferred_element_type=jnp.float32) + bfc_ref[...]
    out_ref[...] = out.reshape(Tc, Bp, Dout).astype(out_ref.dtype)


def conditional_gru_forward(x0, V, params, *, time_chunk=32,
                            matmul_dtype=jnp.float32):
    """x0: (B, Dx) f32, V: (B, T, Dv) f32 -> (B, T, Dout) f32."""
    f32 = jnp.float32
    B, T, Dv = V.shape
    H = params["wx"].shape[0]
    Dout = params["wfc"].shape[0]

    x0 = x0.astype(f32)
    V = V.astype(f32)

    # Padded sizes: full sublane tile on batch, 128-lane-aligned gates.
    Bp = ((B + 7) // 8) * 8
    Hp = max(128, ((H + 127) // 128) * 128)

    w_ih = params["w_ih"].astype(f32)          # (3H, Dv), gate order r, z, n
    w_hh = params["w_hh"].astype(f32)          # (3H, H)
    b_ih = params["b_ih"].astype(f32)          # (3H,)
    b_hh = params["b_hh"].astype(f32)          # (3H,)

    # h0 = tanh(encoder_x(x0)) as a one-off XLA op; padded hidden units are 0.
    h0 = jnp.tanh(x0 @ params["wx"].astype(f32).T + params["bx"].astype(f32))
    h0 = jnp.pad(h0, ((0, Bp - B), (0, Hp - H)))

    # Hoisted input projection for all timesteps.  Fold b_hr / b_hz into the
    # input-side bias; b_hn must stay inside r*( ).
    bias_cat = jnp.concatenate([b_ih[:2 * H] + b_hh[:2 * H], b_ih[2 * H:]])
    gi = jnp.einsum("btd,gd->btg", V, w_ih) + bias_cat           # (B, T, 3H)
    # Per-gate pad to Hp lanes (so r/z/n slices are vreg-aligned), pad batch to
    # Bp, then go time-major.  Padded positions are exactly 0.
    gi = gi.reshape(B, T, 3, H)
    gi = jnp.pad(gi, ((0, Bp - B), (0, 0), (0, 0), (0, Hp - H)))
    gi = gi.reshape(Bp, T, 3 * Hp)
    gi_tbg = jnp.transpose(gi, (1, 0, 2)).astype(matmul_dtype)   # (T, Bp, 3Hp)

    # Time chunking.  Padded tail steps see gi=0 and do mutate h, but padding
    # is strictly at the end of the sequence and those outputs are sliced off.
    Tc = min(time_chunk, T)
    n_chunks = pl.cdiv(T, Tc)
    T_pad = n_chunks * Tc
    if T_pad != T:
        gi_tbg = jnp.pad(gi_tbg, ((0, T_pad - T), (0, 0), (0, 0)))

    # Per-gate zero-padded hidden weights: padded hidden units stay exactly 0
    # through the whole recurrence (zero rows/cols contribute nothing).
    w_hh_p = jnp.zeros((3, Hp, Hp), f32).at[:, :H, :H].set(w_hh.reshape(3, H, H))
    whh_t = jnp.transpose(w_hh_p.reshape(3 * Hp, Hp)).astype(matmul_dtype)  # (Hp, 3Hp)
    bhn = jnp.zeros((1, Hp), f32).at[:, :H].set(b_hh[2 * H:].reshape(1, H))
    wfc_t = (jnp.zeros((Hp, Dout), f32)
             .at[:H, :].set(params["wfc"].astype(f32).T)
             .astype(matmul_dtype))                                         # (Hp, Dout)
    bfc = params["bfc"].astype(f32).reshape(1, Dout)

    const = lambda shape: pl.BlockSpec(shape, lambda t: tuple(0 for _ in shape))

    grid_spec = pltpu.PrefetchScalarGridSpec(
        num_scalar_prefetch=0,
        grid=(n_chunks,),
        in_specs=[
            const((Bp, Hp)),                                      # h0
            pl.BlockSpec((Tc, Bp, 3 * Hp), lambda t: (t, 0, 0)),  # gi chunk
            const((Hp, 3 * Hp)),                                  # whh_t
            const((1, Hp)),                                       # bhn
            const((Hp, Dout)),                                    # wfc_t
            const((1, Dout)),                                     # bfc
        ],
        out_specs=pl.BlockSpec((Tc, Bp, Dout), lambda t: (t, 0, 0)),
        scratch_shapes=[
            pltpu.VMEM((Bp, Hp), jnp.float32),       # hidden-state carry
            pltpu.VMEM((Tc, Bp, Hp), jnp.float32),   # per-chunk hidden states
        ],
    )

    out_tbd = pl.pallas_call(
        _cond_gru_kernel,
        out_shape=jax.ShapeDtypeStruct((T_pad, Bp, Dout), jnp.float32),
        grid_spec=grid_spec,
        compiler_params=pltpu.CompilerParams(
            dimension_semantics=("arbitrary",),
            vmem_limit_bytes=48 * 1024 * 1024,
        ),
    )(h0, gi_tbg, whh_t, bhn, wfc_t, bfc)

    return jnp.transpose(out_tbd[:T, :B], (1, 0, 2))   # (B, T, Dout)


def reference_forward(x0, V, params):
    """Pure-JAX reference mirroring the PyTorch module semantics."""
    H = params["wx"].shape[0]
    wih, whh = params["w_ih"], params["w_hh"]
    bih, bhh = params["b_ih"], params["b_hh"]

    h = jnp.tanh(x0 @ params["wx"].T + params["bx"])
    outs = []
    for t in range(V.shape[1]):
        x_t = V[:, t, :]
        gi = x_t @ wih.T + bih
        gh = h @ whh.T + bhh
        r = jax.nn.sigmoid(gi[:, :H] + gh[:, :H])
        z = jax.nn.sigmoid(gi[:, H:2 * H] + gh[:, H:2 * H])
        n = jnp.tanh(gi[:, 2 * H:] + r * gh[:, 2 * H:])
        h = (1.0 - z) * n + z * h
        outs.append(h)
    hs = jnp.stack(outs, axis=1)                     # (B, T, H)
    return hs @ params["wfc"].T + params["bfc"]      # (B, T, Dout)


def init_params(key, hidden_size, input_size_x=2, input_size_v=2, output_size=2):
    ks = jax.random.split(key, 8)

    def u(k, shape, fan_in):
        bound = 1.0 / jnp.sqrt(fan_in)
        return jax.random.uniform(k, shape, jnp.float32, -bound, bound)

    H = hidden_size
    return {
        "wx":   u(ks[0], (H, input_size_x), input_size_x),
        "bx":   u(ks[1], (H,), input_size_x),
        "w_ih": u(ks[2], (3 * H, input_size_v), H),
        "w_hh": u(ks[3], (3 * H, H), H),
        "b_ih": u(ks[4], (3 * H,), H),
        "b_hh": u(ks[5], (3 * H,), H),
        "wfc":  u(ks[6], (output_size, H), H),
        "bfc":  u(ks[7], (output_size,), H),
    }


if __name__ == "__main__":
    B, T, H = 4, 8, 32
    Dx, Dv, Dout = 2, 2, 2

    key = jax.random.PRNGKey(0)
    k_x0, k_v, k_p = jax.random.split(key, 3)
    x0 = jax.random.normal(k_x0, (B, Dx), jnp.float32)
    V = jax.random.normal(k_v, (B, T, Dv), jnp.float32)
    params = init_params(k_p, H, Dx, Dv, Dout)

    out = jax.block_until_ready(
        conditional_gru_forward(x0, V, params, time_chunk=32))
    ref = jax.block_until_ready(reference_forward(x0, V, params))

    assert out.shape == (B, T, Dout), out.shape
    assert jnp.allclose(out, ref, atol=1e-5, rtol=1e-5), \
        float(jnp.max(jnp.abs(out - ref)))
    print("KERNEL_OK")
</pallas_src>

<mosaic_0001>
module attributes {stable_mosaic.version = 11 : i64} {
  func.func @_cond_gru_kernel(%arg0: i32, %arg1: memref<8x128xf32, #tpu.memory_space<vmem>>, %arg2: memref<8x8x384xf32, #tpu.memory_space<vmem>>, %arg3: memref<128x384xf32, #tpu.memory_space<vmem>>, %arg4: memref<1x128xf32, #tpu.memory_space<vmem>>, %arg5: memref<128x2xf32, #tpu.memory_space<vmem>>, %arg6: memref<1x2xf32, #tpu.memory_space<vmem>>, %arg7: memref<8x8x2xf32, #tpu.memory_space<vmem>>, %arg8: memref<8x128xf32, #tpu.memory_space<vmem>>, %arg9: memref<8x8x128xf32, #tpu.memory_space<vmem>>) attributes {dimension_semantics = [#tpu.dimension_semantics<arbitrary>], iteration_bounds = array<i64: 1>, scalar_prefetch = 0 : i64, scratch_operands = 2 : i64, tpu.core_type = #tpu.core_type<tc>, window_params = [{pipeline_mode = #tpu.pipeline_mode<synchronous>, transform_indices = @transform_0, window_bounds = array<i64: 8, 128>}, {transform_indices = @transform_1, window_bounds = array<i64: 8, 8, 384>}, {pipeline_mode = #tpu.pipeline_mode<synchronous>, transform_indices = @transform_2, window_bounds = array<i64: 128, 384>}, {pipeline_mode = #tpu.pipeline_mode<synchronous>, transform_indices = @transform_3, window_bounds = array<i64: 1, 128>}, {pipeline_mode = #tpu.pipeline_mode<synchronous>, transform_indices = @transform_4, window_bounds = array<i64: 128, 2>}, {pipeline_mode = #tpu.pipeline_mode<synchronous>, transform_indices = @transform_5, window_bounds = array<i64: 1, 2>}, {transform_indices = @transform_6, window_bounds = array<i64: 8, 8, 2>}]} {
    %c0_i32 = arith.constant 0 : i32
    %0 = arith.cmpi eq, %arg0, %c0_i32 : i32
    %1 = arith.extui %0 : i1 to i32
    %c0_i32_0 = arith.constant 0 : i32
    %2 = arith.cmpi ne, %1, %c0_i32_0 : i32
    scf.if %2 {
      %c0_97 = arith.constant 0 : index
      %c0_98 = arith.constant 0 : index
      %305 = vector.load %arg1[%c0_97, %c0_98] : memref<8x128xf32, #tpu.memory_space<vmem>>, vector<8x128xf32>
      %c0_99 = arith.constant 0 : index
      %c0_100 = arith.constant 0 : index
      %306 = vector.load %arg8[%c0_99, %c0_100] : memref<8x128xf32, #tpu.memory_space<vmem>>, vector<8x128xf32>
      tpu.vector_store %arg8[%c0_99, %c0_100], %305 {strides = array<i32>} : memref<8x128xf32, #tpu.memory_space<vmem>>, vector<8x128xf32>,
    } else {
    }
    %c0 = arith.constant 0 : index
    %c0_1 = arith.constant 0 : index
    %3 = vector.load %arg4[%c0, %c0_1] : memref<1x128xf32, #tpu.memory_space<vmem>>, vector<1x128xf32>
    %4 = vector.shape_cast %3 : vector<1x128xf32> to vector<1x128xf32>
    %5 = vector.broadcast %4 : vector<1x128xf32> to vector<8x128xf32>
    %c0_2 = arith.constant 0 : index
    %c0_3 = arith.constant 0 : index
    %6 = vector.load %arg8[%c0_2, %c0_3] : memref<8x128xf32, #tpu.memory_space<vmem>>, vector<8x128xf32>
    %c0_i32_4 = arith.constant 0 : i32
    %7 = arith.index_cast %c0_i32_4 : i32 to index
    %c0_5 = arith.constant 0 : index
    %c0_6 = arith.constant 0 : index
    %8 = vector.load %arg2[%7, %c0_5, %c0_6] : memref<8x8x384xf32, #tpu.memory_space<vmem>>, vector<1x8x384xf32>
    %9 = vector.shape_cast %8 : vector<1x8x384xf32> to vector<8x384xf32>
    %c0_7 = arith.constant 0 : index
    %c0_8 = arith.constant 0 : index
    %10 = vector.load %arg3[%c0_7, %c0_8] : memref<128x384xf32, #tpu.memory_space<vmem>>, vector<128x384xf32>
    %cst = arith.constant dense<0.000000e+00> : vector<8x384xf32>
    %11 = tpu.matmul %6, %10, %cst {dimension_numbers = #tpu.dot_dimension_numbers<[1], [0], [0], [1], [0, 0, 1, 1], [], []>} : vector<8x128xf32>, vector<128x384xf32>, vector<8x384xf32> -> vector<8x384xf32>
    %12 = vector.extract_strided_slice %9 {offsets = [0, 0], sizes = [8, 128], strides = [1, 1]} : vector<8x384xf32> to vector<8x128xf32>
    %13 = vector.extract_strided_slice %11 {offsets = [0, 0], sizes = [8, 128], strides = [1, 1]} : vector<8x384xf32> to vector<8x128xf32>
    %14 = arith.addf %12, %13 : vector<8x128xf32>
    %15 = arith.negf %14 : vector<8x128xf32>
    %16 = math.exp %15 : vector<8x128xf32>
    %cst_9 = arith.constant 1.000000e+00 : f32
    %17 = vector.broadcast %cst_9 : f32 to vector<8x128xf32>
    %18 = arith.addf %17, %16 : vector<8x128xf32>
    %19 = arith.divf %17, %18 : vector<8x128xf32>
    %20 = vector.extract_strided_slice %9 {offsets = [0, 128], sizes = [8, 128], strides = [1, 1]} : vector<8x384xf32> to vector<8x128xf32>
    %21 = vector.extract_strided_slice %11 {offsets = [0, 128], sizes = [8, 128], strides = [1, 1]} : vector<8x384xf32> to vector<8x128xf32>
    %22 = arith.addf %20, %21 : vector<8x128xf32>
    %23 = arith.negf %22 : vector<8x128xf32>
    %24 = math.exp %23 : vector<8x128xf32>
    %cst_10 = arith.constant 1.000000e+00 : f32
    %25 = vector.broadcast %cst_10 : f32 to vector<8x128xf32>
    %26 = arith.addf %25, %24 : vector<8x128xf32>
    %27 = arith.divf %25, %26 : vector<8x128xf32>
    %28 = vector.extract_strided_slice %9 {offsets = [0, 256], sizes = [8, 128], strides = [1, 1]} : vector<8x384xf32> to vector<8x128xf32>
    %29 = vector.extract_strided_slice %11 {offsets = [0, 256], sizes = [8, 128], strides = [1, 1]} : vector<8x384xf32> to vector<8x128xf32>
    %30 = arith.addf %29, %5 : vector<8x128xf32>
    %31 = arith.mulf %19, %30 : vector<8x128xf32>
    %32 = arith.addf %28, %31 : vector<8x128xf32>
    %33 = math.tanh %32 : vector<8x128xf32>
    %cst_11 = arith.constant 1.000000e+00 : f32
    %34 = vector.broadcast %cst_11 : f32 to vector<8x128xf32>
    %35 = arith.subf %34, %27 : vector<8x128xf32>
    %36 = arith.mulf %35, %33 : vector<8x128xf32>
    %37 = arith.mulf %27, %6 : vector<8x128xf32>
    %38 = arith.addf %36, %37 : vector<8x128xf32>
    %39 = arith.index_cast %c0_i32_4 : i32 to index
    %c0_12 = arith.constant 0 : index
    %c0_13 = arith.constant 0 : index
    %40 = vector.load %arg9[%39, %c0_12, %c0_13] : memref<8x8x128xf32, #tpu.memory_space<vmem>>, vector<1x8x128xf32>
    %41 = vector.shape_cast %40 : vector<1x8x128xf32> to vector<8x128xf32>
    %42 = vector.shape_cast %38 : vector<8x128xf32> to vector<1x8x128xf32>
    tpu.vector_store %arg9[%39, %c0_12, %c0_13], %42 {strides = array<i32>} : memref<8x8x128xf32, #tpu.memory_space<vmem>>, vector<1x8x128xf32>,
    %c1_i32 = arith.constant 1 : i32
    %43 = arith.index_cast %c1_i32 : i32 to index
    %c0_14 = arith.constant 0 : index
    %c0_15 = arith.constant 0 : index
    %44 = vector.load %arg2[%43, %c0_14, %c0_15] : memref<8x8x384xf32, #tpu.memory_space<vmem>>, vector<1x8x384xf32>
    %45 = vector.shape_cast %44 : vector<1x8x384xf32> to vector<8x384xf32>
    %c0_16 = arith.constant 0 : index
    %c0_17 = arith.constant 0 : index
    %46 = vector.load %arg3[%c0_16, %c0_17] : memref<128x384xf32, #tpu.memory_space<vmem>>, vector<128x384xf32>
    %cst_18 = arith.constant dense<0.000000e+00> : vector<8x384xf32>
    %47 = tpu.matmul %38, %46, %cst_18 {dimension_numbers = #tpu.dot_dimension_numbers<[1], [0], [0], [1], [0, 0, 1, 1], [], []>} : vector<8x128xf32>, vector<128x384xf32>, vector<8x384xf32> -> vector<8x384xf32>
    %48 = vector.extract_strided_slice %45 {offsets = [0, 0], sizes = [8, 128], strides = [1, 1]} : vector<8x384xf32> to vector<8x128xf32>
    %49 = vector.extract_strided_slice %47 {offsets = [0, 0], sizes = [8, 128], strides = [1, 1]} : vector<8x384xf32> to vector<8x128xf32>
    %50 = arith.addf %48, %49 : vector<8x128xf32>
    %51 = arith.negf %50 : vector<8x128xf32>
    %52 = math.exp %51 : vector<8x128xf32>
    %cst_19 = arith.constant 1.000000e+00 : f32
    %53 = vector.broadcast %cst_19 : f32 to vector<8x128xf32>
    %54 = arith.addf %53, %52 : vector<8x128xf32>
    %55 = arith.divf %53, %54 : vector<8x128xf32>
    %56 = vector.extract_strided_slice %45 {offsets = [0, 128], sizes = [8, 128], strides = [1, 1]} : vector<8x384xf32> to vector<8x128xf32>
    %57 = vector.extract_strided_slice %47 {offsets = [0, 128], sizes = [8, 128], strides = [1, 1]} : vector<8x384xf32> to vector<8x128xf32>
    %58 = arith.addf %56, %57 : vector<8x128xf32>
    %59 = arith.negf %58 : vector<8x128xf32>
    %60 = math.exp %59 : vector<8x128xf32>
    %cst_20 = arith.constant 1.000000e+00 : f32
    %61 = vector.broadcast %cst_20 : f32 to vector<8x128xf32>
    %62 = arith.addf %61, %60 : vector<8x128xf32>
    %63 = arith.divf %61, %62 : vector<8x128xf32>
    %64 = vector.extract_strided_slice %45 {offsets = [0, 256], sizes = [8, 128], strides = [1, 1]} : vector<8x384xf32> to vector<8x128xf32>
    %65 = vector.extract_strided_slice %47 {offsets = [0, 256], sizes = [8, 128], strides = [1, 1]} : vector<8x384xf32> to vector<8x128xf32>
    %66 = arith.addf %65, %5 : vector<8x128xf32>
    %67 = arith.mulf %55, %66 : vector<8x128xf32>
    %68 = arith.addf %64, %67 : vector<8x128xf32>
    %69 = math.tanh %68 : vector<8x128xf32>
    %cst_21 = arith.constant 1.000000e+00 : f32
    %70 = vector.broadcast %cst_21 : f32 to vector<8x128xf32>
    %71 = arith.subf %70, %63 : vector<8x128xf32>
    %72 = arith.mulf %71, %69 : vector<8x128xf32>
    %73 = arith.mulf %63, %38 : vector<8x128xf32>
    %74 = arith.addf %72, %73 : vector<8x128xf32>
    %75 = arith.index_cast %c1_i32 : i32 to index
    %c0_22 = arith.constant 0 : index
    %c0_23 = arith.constant 0 : index
    %76 = vector.load %arg9[%75, %c0_22, %c0_23] : memref<8x8x128xf32, #tpu.memory_space<vmem>>, vector<1x8x128xf32>
    %77 = vector.shape_cast %76 : vector<1x8x128xf32> to vector<8x128xf32>
    %78 = vector.shape_cast %74 : vector<8x128xf32> to vector<1x8x128xf32>
    tpu.vector_store %arg9[%75, %c0_22, %c0_23], %78 {strides = array<i32>} : memref<8x8x128xf32, #tpu.memory_space<vmem>>, vector<1x8x128xf32>,
    %c2_i32 = arith.constant 2 : i32
    %79 = arith.index_cast %c2_i32 : i32 to index
    %c0_24 = arith.constant 0 : index
    %c0_25 = arith.constant 0 : index
    %80 = vector.load %arg2[%79, %c0_24, %c0_25] : memref<8x8x384xf32, #tpu.memory_space<vmem>>, vector<1x8x384xf32>
    %81 = vector.shape_cast %80 : vector<1x8x384xf32> to vector<8x384xf32>
    %c0_26 = arith.constant 0 : index
    %c0_27 = arith.constant 0 : index
    %82 = vector.load %arg3[%c0_26, %c0_27] : memref<128x384xf32, #tpu.memory_space<vmem>>, vector<128x384xf32>
    %cst_28 = arith.constant dense<0.000000e+00> : vector<8x384xf32>
    %83 = tpu.matmul %74, %82, %cst_28 {dimension_numbers = #tpu.dot_dimension_numbers<[1], [0], [0], [1], [0, 0, 1, 1], [], []>} : vector<8x128xf32>, vector<128x384xf32>, vector<8x384xf32> -> vector<8x384xf32>
    %84 = vector.extract_strided_slice %81 {offsets = [0, 0], sizes = [8, 128], strides = [1, 1]} : vector<8x384xf32> to vector<8x128xf32>
    %85 = vector.extract_strided_slice %83 {offsets = [0, 0], sizes = [8, 128], strides = [1, 1]} : vector<8x384xf32> to vector<8x128xf32>
    %86 = arith.addf %84, %85 : vector<8x128xf32>
    %87 = arith.negf %86 : vector<8x128xf32>
    %88 = math.exp %87 : vector<8x128xf32>
    %cst_29 = arith.constant 1.000000e+00 : f32
    %89 = vector.broadcast %cst_29 : f32 to vector<8x128xf32>
    %90 = arith.addf %89, %88 : vector<8x128xf32>
    %91 = arith.divf %89, %90 : vector<8x128xf32>
    %92 = vector.extract_strided_slice %81 {offsets = [0, 128], sizes = [8, 128], strides = [1, 1]} : vector<8x384xf32> to vector<8x128xf32>
    %93 = vector.extract_strided_slice %83 {offsets = [0, 128], sizes = [8, 128], strides = [1, 1]} : vector<8x384xf32> to vector<8x128xf32>
    %94 = arith.addf %92, %93 : vector<8x128xf32>
    %95 = arith.negf %94 : vector<8x128xf32>
    %96 = math.exp %95 : vector<8x128xf32>
    %cst_30 = arith.constant 1.000000e+00 : f32
    %97 = vector.broadcast %cst_30 : f32 to vector<8x128xf32>
    %98 = arith.addf %97, %96 : vector<8x128xf32>
    %99 = arith.divf %97, %98 : vector<8x128xf32>
    %100 = vector.extract_strided_slice %81 {offsets = [0, 256], sizes = [8, 128], strides = [1, 1]} : vector<8x384xf32> to vector<8x128xf32>
    %101 = vector.extract_strided_slice %83 {offsets = [0, 256], sizes = [8, 128], strides = [1, 1]} : vector<8x384xf32> to vector<8x128xf32>
    %102 = arith.addf %101, %5 : vector<8x128xf32>
    %103 = arith.mulf %91, %102 : vector<8x128xf32>
    %104 = arith.addf %100, %103 : vector<8x128xf32>
    %105 = math.tanh %104 : vector<8x128xf32>
    %cst_31 = arith.constant 1.000000e+00 : f32
    %106 = vector.broadcast %cst_31 : f32 to vector<8x128xf32>
    %107 = arith.subf %106, %99 : vector<8x128xf32>
    %108 = arith.mulf %107, %105 : vector<8x128xf32>
    %109 = arith.mulf %99, %74 : vector<8x128xf32>
    %110 = arith.addf %108, %109 : vector<8x128xf32>
    %111 = arith.index_cast %c2_i32 : i32 to index
    %c0_32 = arith.constant 0 : index
    %c0_33 = arith.constant 0 : index
    %112 = vector.load %arg9[%111, %c0_32, %c0_33] : memref<8x8x128xf32, #tpu.memory_space<vmem>>, vector<1x8x128xf32>
    %113 = vector.shape_cast %112 : vector<1x8x128xf32> to vector<8x128xf32>
    %114 = vector.shape_cast %110 : vector<8x128xf32> to vector<1x8x128xf32>
    tpu.vector_store %arg9[%111, %c0_32, %c0_33], %114 {strides = array<i32>} : memref<8x8x128xf32, #tpu.memory_space<vmem>>, vector<1x8x128xf32>,
    %c3_i32 = arith.constant 3 : i32
    %115 = arith.index_cast %c3_i32 : i32 to index
    %c0_34 = arith.constant 0 : index
    %c0_35 = arith.constant 0 : index
    %116 = vector.load %arg2[%115, %c0_34, %c0_35] : memref<8x8x384xf32, #tpu.memory_space<vmem>>, vector<1x8x384xf32>
    %117 = vector.shape_cast %116 : vector<1x8x384xf32> to vector<8x384xf32>
    %c0_36 = arith.constant 0 : index
    %c0_37 = arith.constant 0 : index
    %118 = vector.load %arg3[%c0_36, %c0_37] : memref<128x384xf32, #tpu.memory_space<vmem>>, vector<128x384xf32>
    %cst_38 = arith.constant dense<0.000000e+00> : vector<8x384xf32>
    %119 = tpu.matmul %110, %118, %cst_38 {dimension_numbers = #tpu.dot_dimension_numbers<[1], [0], [0], [1], [0, 0, 1, 1], [], []>} : vector<8x128xf32>, vector<128x384xf32>, vector<8x384xf32> -> vector<8x384xf32>
    %120 = vector.extract_strided_slice %117 {offsets = [0, 0], sizes = [8, 128], strides = [1, 1]} : vector<8x384xf32> to vector<8x128xf32>
    %121 = vector.extract_strided_slice %119 {offsets = [0, 0], sizes = [8, 128], strides = [1, 1]} : vector<8x384xf32> to vector<8x128xf32>
    %122 = arith.addf %120, %121 : vector<8x128xf32>
    %123 = arith.negf %122 : vector<8x128xf32>
    %124 = math.exp %123 : vector<8x128xf32>
    %cst_39 = arith.constant 1.000000e+00 : f32
    %125 = vector.broadcast %cst_39 : f32 to vector<8x128xf32>
    %126 = arith.addf %125, %124 : vector<8x128xf32>
    %127 = arith.divf %125, %126 : vector<8x128xf32>
    %128 = vector.extract_strided_slice %117 {offsets = [0, 128], sizes = [8, 128], strides = [1, 1]} : vector<8x384xf32> to vector<8x128xf32>
    %129 = vector.extract_strided_slice %119 {offsets = [0, 128], sizes = [8, 128], strides = [1, 1]} : vector<8x384xf32> to vector<8x128xf32>
    %130 = arith.addf %128, %129 : vector<8x128xf32>
    %131 = arith.negf %130 : vector<8x128xf32>
    %132 = math.exp %131 : vector<8x128xf32>
    %cst_40 = arith.constant 1.000000e+00 : f32
    %133 = vector.broadcast %cst_40 : f32 to vector<8x128xf32>
    %134 = arith.addf %133, %132 : vector<8x128xf32>
    %135 = arith.divf %133, %134 : vector<8x128xf32>
    %136 = vector.extract_strided_slice %117 {offsets = [0, 256], sizes = [8, 128], strides = [1, 1]} : vector<8x384xf32> to vector<8x128xf32>
    %137 = vector.extract_strided_slice %119 {offsets = [0, 256], sizes = [8, 128], strides = [1, 1]} : vector<8x384xf32> to vector<8x128xf32>
    %138 = arith.addf %137, %5 : vector<8x128xf32>
    %139 = arith.mulf %127, %138 : vector<8x128xf32>
    %140 = arith.addf %136, %139 : vector<8x128xf32>
    %141 = math.tanh %140 : vector<8x128xf32>
    %cst_41 = arith.constant 1.000000e+00 : f32
    %142 = vector.broadcast %cst_41 : f32 to vector<8x128xf32>
    %143 = arith.subf %142, %135 : vector<8x128xf32>
    %144 = arith.mulf %143, %141 : vector<8x128xf32>
    %145 = arith.mulf %135, %110 : vector<8x128xf32>
    %146 = arith.addf %144, %145 : vector<8x128xf32>
    %147 = arith.index_cast %c3_i32 : i32 to index
    %c0_42 = arith.constant 0 : index
    %c0_43 = arith.constant 0 : index
    %148 = vector.load %arg9[%147, %c0_42, %c0_43] : memref<8x8x128xf32, #tpu.memory_space<vmem>>, vector<1x8x128xf32>
    %149 = vector.shape_cast %148 : vector<1x8x128xf32> to vector<8x128xf32>
    %150 = vector.shape_cast %146 : vector<8x128xf32> to vector<1x8x128xf32>
    tpu.vector_store %arg9[%147, %c0_42, %c0_43], %150 {strides = array<i32>} : memref<8x8x128xf32, #tpu.memory_space<vmem>>, vector<1x8x128xf32>,
    %c4_i32 = arith.constant 4 : i32
    %151 = arith.index_cast %c4_i32 : i32 to index
    %c0_44 = arith.constant 0 : index
    %c0_45 = arith.constant 0 : index
    %152 = vector.load %arg2[%151, %c0_44, %c0_45] : memref<8x8x384xf32, #tpu.memory_space<vmem>>, vector<1x8x384xf32>
    %153 = vector.shape_cast %152 : vector<1x8x384xf32> to vector<8x384xf32>
    %c0_46 = arith.constant 0 : index
    %c0_47 = arith.constant 0 : index
    %154 = vector.load %arg3[%c0_46, %c0_47] : memref<128x384xf32, #tpu.memory_space<vmem>>, vector<128x384xf32>
    %cst_48 = arith.constant dense<0.000000e+00> : vector<8x384xf32>
    %155 = tpu.matmul %146, %154, %cst_48 {dimension_numbers = #tpu.dot_dimension_numbers<[1], [0], [0], [1], [0, 0, 1, 1], [], []>} : vector<8x128xf32>, vector<128x384xf32>, vector<8x384xf32> -> vector<8x384xf32>
    %156 = vector.extract_strided_slice %153 {offsets = [0, 0], sizes = [8, 128], strides = [1, 1]} : vector<8x384xf32> to vector<8x128xf32>
    %157 = vector.extract_strided_slice %155 {offsets = [0, 0], sizes = [8, 128], strides = [1, 1]} : vector<8x384xf32> to vector<8x128xf32>
    %158 = arith.addf %156, %157 : vector<8x128xf32>
    %159 = arith.negf %158 : vector<8x128xf32>
    %160 = math.exp %159 : vector<8x128xf32>
    %cst_49 = arith.constant 1.000000e+00 : f32
    %161 = vector.broadcast %cst_49 : f32 to vector<8x128xf32>
    %162 = arith.addf %161, %160 : vector<8x128xf32>
    %163 = arith.divf %161, %162 : vector<8x128xf32>
    %164 = vector.extract_strided_slice %153 {offsets = [0, 128], sizes = [8, 128], strides = [1, 1]} : vector<8x384xf32> to vector<8x128xf32>
    %165 = vector.extract_strided_slice %155 {offsets = [0, 128], sizes = [8, 128], strides = [1, 1]} : vector<8x384xf32> to vector<8x128xf32>
    %166 = arith.addf %164, %165 : vector<8x128xf32>
    %167 = arith.negf %166 : vector<8x128xf32>
    %168 = math.exp %167 : vector<8x128xf32>
    %cst_50 = arith.constant 1.000000e+00 : f32
    %169 = vector.broadcast %cst_50 : f32 to vector<8x128xf32>
    %170 = arith.addf %169, %168 : vector<8x128xf32>
    %171 = arith.divf %169, %170 : vector<8x128xf32>
    %172 = vector.extract_strided_slice %153 {offsets = [0, 256], sizes = [8, 128], strides = [1, 1]} : vector<8x384xf32> to vector<8x128xf32>
    %173 = vector.extract_strided_slice %155 {offsets = [0, 256], sizes = [8, 128], strides = [1, 1]} : vector<8x384xf32> to vector<8x128xf32>
    %174 = arith.addf %173, %5 : vector<8x128xf32>
    %175 = arith.mulf %163, %174 : vector<8x128xf32>
    %176 = arith.addf %172, %175 : vector<8x128xf32>
    %177 = math.tanh %176 : vector<8x128xf32>
    %cst_51 = arith.constant 1.000000e+00 : f32
    %178 = vector.broadcast %cst_51 : f32 to vector<8x128xf32>
    %179 = arith.subf %178, %171 : vector<8x128xf32>
    %180 = arith.mulf %179, %177 : vector<8x128xf32>
    %181 = arith.mulf %171, %146 : vector<8x128xf32>
    %182 = arith.addf %180, %181 : vector<8x128xf32>
    %183 = arith.index_cast %c4_i32 : i32 to index
    %c0_52 = arith.constant 0 : index
    %c0_53 = arith.constant 0 : index
    %184 = vector.load %arg9[%183, %c0_52, %c0_53] : memref<8x8x128xf32, #tpu.memory_space<vmem>>, vector<1x8x128xf32>
    %185 = vector.shape_cast %184 : vector<1x8x128xf32> to vector<8x128xf32>
    %186 = vector.shape_cast %182 : vector<8x128xf32> to vector<1x8x128xf32>
    tpu.vector_store %arg9[%183, %c0_52, %c0_53], %186 {strides = array<i32>} : memref<8x8x128xf32, #tpu.memory_space<vmem>>, vector<1x8x128xf32>,
    %c5_i32 = arith.constant 5 : i32
    %187 = arith.index_cast %c5_i32 : i32 to index
    %c0_54 = arith.constant 0 : index
    %c0_55 = arith.constant 0 : index
    %188 = vector.load %arg2[%187, %c0_54, %c0_55] : memref<8x8x384xf32, #tpu.memory_space<vmem>>, vector<1x8x384xf32>
    %189 = vector.shape_cast %188 : vector<1x8x384xf32> to vector<8x384xf32>
    %c0_56 = arith.constant 0 : index
    %c0_57 = arith.constant 0 : index
    %190 = vector.load %arg3[%c0_56, %c0_57] : memref<128x384xf32, #tpu.memory_space<vmem>>, vector<128x384xf32>
    %cst_58 = arith.constant dense<0.000000e+00> : vector<8x384xf32>
    %191 = tpu.matmul %182, %190, %cst_58 {dimension_numbers = #tpu.dot_dimension_numbers<[1], [0], [0], [1], [0, 0, 1, 1], [], []>} : vector<8x128xf32>, vector<128x384xf32>, vector<8x384xf32> -> vector<8x384xf32>
    %192 = vector.extract_strided_slice %189 {offsets = [0, 0], sizes = [8, 128], strides = [1, 1]} : vector<8x384xf32> to vector<8x128xf32>
    %193 = vector.extract_strided_slice %191 {offsets = [0, 0], sizes = [8, 128], strides = [1, 1]} : vector<8x384xf32> to vector<8x128xf32>
    %194 = arith.addf %192, %193 : vector<8x128xf32>
    %195 = arith.negf %194 : vector<8x128xf32>
    %196 = math.exp %195 : vector<8x128xf32>
    %cst_59 = arith.constant 1.000000e+00 : f32
    %197 = vector.broadcast %cst_59 : f32 to vector<8x128xf32>
    %198 = arith.addf %197, %196 : vector<8x128xf32>
    %199 = arith.divf %197, %198 : vector<8x128xf32>
    %200 = vector.extract_strided_slice %189 {offsets = [0, 128], sizes = [8, 128], strides = [1, 1]} : vector<8x384xf32> to vector<8x128xf32>
    %201 = vector.extract_strided_slice %191 {offsets = [0, 128], sizes = [8, 128], strides = [1, 1]} : vector<8x384xf32> to vector<8x128xf32>
    %202 = arith.addf %200, %201 : vector<8x128xf32>
    %203 = arith.negf %202 : vector<8x128xf32>
    %204 = math.exp %203 : vector<8x128xf32>
    %cst_60 = arith.constant 1.000000e+00 : f32
    %205 = vector.broadcast %cst_60 : f32 to vector<8x128xf32>
    %206 = arith.addf %205, %204 : vector<8x128xf32>
    %207 = arith.divf %205, %206 : vector<8x128xf32>
    %208 = vector.extract_strided_slice %189 {offsets = [0, 256], sizes = [8, 128], strides = [1, 1]} : vector<8x384xf32> to vector<8x128xf32>
    %209 = vector.extract_strided_slice %191 {offsets = [0, 256], sizes = [8, 128], strides = [1, 1]} : vector<8x384xf32> to vector<8x128xf32>
    %210 = arith.addf %209, %5 : vector<8x128xf32>
    %211 = arith.mulf %199, %210 : vector<8x128xf32>
    %212 = arith.addf %208, %211 : vector<8x128xf32>
    %213 = math.tanh %212 : vector<8x128xf32>
    %cst_61 = arith.constant 1.000000e+00 : f32
    %214 = vector.broadcast %cst_61 : f32 to vector<8x128xf32>
    %215 = arith.subf %214, %207 : vector<8x128xf32>
    %216 = arith.mulf %215, %213 : vector<8x128xf32>
    %217 = arith.mulf %207, %182 : vector<8x128xf32>
    %218 = arith.addf %216, %217 : vector<8x128xf32>
    %219 = arith.index_cast %c5_i32 : i32 to index
    %c0_62 = arith.constant 0 : index
    %c0_63 = arith.constant 0 : index
    %220 = vector.load %arg9[%219, %c0_62, %c0_63] : memref<8x8x128xf32, #tpu.memory_space<vmem>>, vector<1x8x128xf32>
    %221 = vector.shape_cast %220 : vector<1x8x128xf32> to vector<8x128xf32>
    %222 = vector.shape_cast %218 : vector<8x128xf32> to vector<1x8x128xf32>
    tpu.vector_store %arg9[%219, %c0_62, %c0_63], %222 {strides = array<i32>} : memref<8x8x128xf32, #tpu.memory_space<vmem>>, vector<1x8x128xf32>,
    %c6_i32 = arith.constant 6 : i32
    %223 = arith.index_cast %c6_i32 : i32 to index
    %c0_64 = arith.constant 0 : index
    %c0_65 = arith.constant 0 : index
    %224 = vector.load %arg2[%223, %c0_64, %c0_65] : memref<8x8x384xf32, #tpu.memory_space<vmem>>, vector<1x8x384xf32>
    %225 = vector.shape_cast %224 : vector<1x8x384xf32> to vector<8x384xf32>
    %c0_66 = arith.constant 0 : index
    %c0_67 = arith.constant 0 : index
    %226 = vector.load %arg3[%c0_66, %c0_67] : memref<128x384xf32, #tpu.memory_space<vmem>>, vector<128x384xf32>
    %cst_68 = arith.constant dense<0.000000e+00> : vector<8x384xf32>
    %227 = tpu.matmul %218, %226, %cst_68 {dimension_numbers = #tpu.dot_dimension_numbers<[1], [0], [0], [1], [0, 0, 1, 1], [], []>} : vector<8x128xf32>, vector<128x384xf32>, vector<8x384xf32> -> vector<8x384xf32>
    %228 = vector.extract_strided_slice %225 {offsets = [0, 0], sizes = [8, 128], strides = [1, 1]} : vector<8x384xf32> to vector<8x128xf32>
    %229 = vector.extract_strided_slice %227 {offsets = [0, 0], sizes = [8, 128], strides = [1, 1]} : vector<8x384xf32> to vector<8x128xf32>
    %230 = arith.addf %228, %229 : vector<8x128xf32>
    %231 = arith.negf %230 : vector<8x128xf32>
    %232 = math.exp %231 : vector<8x128xf32>
    %cst_69 = arith.constant 1.000000e+00 : f32
    %233 = vector.broadcast %cst_69 : f32 to vector<8x128xf32>
    %234 = arith.addf %233, %232 : vector<8x128xf32>
    %235 = arith.divf %233, %234 : vector<8x128xf32>
    %236 = vector.extract_strided_slice %225 {offsets = [0, 128], sizes = [8, 128], strides = [1, 1]} : vector<8x384xf32> to vector<8x128xf32>
    %237 = vector.extract_strided_slice %227 {offsets = [0, 128], sizes = [8, 128], strides = [1, 1]} : vector<8x384xf32> to vector<8x128xf32>
    %238 = arith.addf %236, %237 : vector<8x128xf32>
    %239 = arith.negf %238 : vector<8x128xf32>
    %240 = math.exp %239 : vector<8x128xf32>
    %cst_70 = arith.constant 1.000000e+00 : f32
    %241 = vector.broadcast %cst_70 : f32 to vector<8x128xf32>
    %242 = arith.addf %241, %240 : vector<8x128xf32>
    %243 = arith.divf %241, %242 : vector<8x128xf32>
    %244 = vector.extract_strided_slice %225 {offsets = [0, 256], sizes = [8, 128], strides = [1, 1]} : vector<8x384xf32> to vector<8x128xf32>
    %245 = vector.extract_strided_slice %227 {offsets = [0, 256], sizes = [8, 128], strides = [1, 1]} : vector<8x384xf32> to vector<8x128xf32>
    %246 = arith.addf %245, %5 : vector<8x128xf32>
    %247 = arith.mulf %235, %246 : vector<8x128xf32>
    %248 = arith.addf %244, %247 : vector<8x128xf32>
    %249 = math.tanh %248 : vector<8x128xf32>
    %cst_71 = arith.constant 1.000000e+00 : f32
    %250 = vector.broadcast %cst_71 : f32 to vector<8x128xf32>
    %251 = arith.subf %250, %243 : vector<8x128xf32>
    %252 = arith.mulf %251, %249 : vector<8x128xf32>
    %253 = arith.mulf %243, %218 : vector<8x128xf32>
    %254 = arith.addf %252, %253 : vector<8x128xf32>
    %255 = arith.index_cast %c6_i32 : i32 to index
    %c0_72 = arith.constant 0 : index
    %c0_73 = arith.constant 0 : index
    %256 = vector.load %arg9[%255, %c0_72, %c0_73] : memref<8x8x128xf32, #tpu.memory_space<vmem>>, vector<1x8x128xf32>
    %257 = vector.shape_cast %256 : vector<1x8x128xf32> to vector<8x128xf32>
    %258 = vector.shape_cast %254 : vector<8x128xf32> to vector<1x8x128xf32>
    tpu.vector_store %arg9[%255, %c0_72, %c0_73], %258 {strides = array<i32>} : memref<8x8x128xf32, #tpu.memory_space<vmem>>, vector<1x8x128xf32>,
    %c7_i32 = arith.constant 7 : i32
    %259 = arith.index_cast %c7_i32 : i32 to index
    %c0_74 = arith.constant 0 : index
    %c0_75 = arith.constant 0 : index
    %260 = vector.load %arg2[%259, %c0_74, %c0_75] : memref<8x8x384xf32, #tpu.memory_space<vmem>>, vector<1x8x384xf32>
    %261 = vector.shape_cast %260 : vector<1x8x384xf32> to vector<8x384xf32>
    %c0_76 = arith.constant 0 : index
    %c0_77 = arith.constant 0 : index
    %262 = vector.load %arg3[%c0_76, %c0_77] : memref<128x384xf32, #tpu.memory_space<vmem>>, vector<128x384xf32>
    %cst_78 = arith.constant dense<0.000000e+00> : vector<8x384xf32>
    %263 = tpu.matmul %254, %262, %cst_78 {dimension_numbers = #tpu.dot_dimension_numbers<[1], [0], [0], [1], [0, 0, 1, 1], [], []>} : vector<8x128xf32>, vector<128x384xf32>, vector<8x384xf32> -> vector<8x384xf32>
    %264 = vector.extract_strided_slice %261 {offsets = [0, 0], sizes = [8, 128], strides = [1, 1]} : vector<8x384xf32> to vector<8x128xf32>
    %265 = vector.extract_strided_slice %263 {offsets = [0, 0], sizes = [8, 128], strides = [1, 1]} : vector<8x384xf32> to vector<8x128xf32>
    %266 = arith.addf %264, %265 : vector<8x128xf32>
    %267 = arith.negf %266 : vector<8x128xf32>
    %268 = math.exp %267 : vector<8x128xf32>
    %cst_79 = arith.constant 1.000000e+00 : f32
    %269 = vector.broadcast %cst_79 : f32 to vector<8x128xf32>
    %270 = arith.addf %269, %268 : vector<8x128xf32>
    %271 = arith.divf %269, %270 : vector<8x128xf32>
    %272 = vector.extract_strided_slice %261 {offsets = [0, 128], sizes = [8, 128], strides = [1, 1]} : vector<8x384xf32> to vector<8x128xf32>
    %273 = vector.extract_strided_slice %263 {offsets = [0, 128], sizes = [8, 128], strides = [1, 1]} : vector<8x384xf32> to vector<8x128xf32>
    %274 = arith.addf %272, %273 : vector<8x128xf32>
    %275 = arith.negf %274 : vector<8x128xf32>
    %276 = math.exp %275 : vector<8x128xf32>
    %cst_80 = arith.constant 1.000000e+00 : f32
    %277 = vector.broadcast %cst_80 : f32 to vector<8x128xf32>
    %278 = arith.addf %277, %276 : vector<8x128xf32>
    %279 = arith.divf %277, %278 : vector<8x128xf32>
    %280 = vector.extract_strided_slice %261 {offsets = [0, 256], sizes = [8, 128], strides = [1, 1]} : vector<8x384xf32> to vector<8x128xf32>
    %281 = vector.extract_strided_slice %263 {offsets = [0, 256], sizes = [8, 128], strides = [1, 1]} : vector<8x384xf32> to vector<8x128xf32>
    %282 = arith.addf %281, %5 : vector<8x128xf32>
    %283 = arith.mulf %271, %282 : vector<8x128xf32>
    %284 = arith.addf %280, %283 : vector<8x128xf32>
    %285 = math.tanh %284 : vector<8x128xf32>
    %cst_81 = arith.constant 1.000000e+00 : f32
    %286 = vector.broadcast %cst_81 : f32 to vector<8x128xf32>
    %287 = arith.subf %286, %279 : vector<8x128xf32>
    %288 = arith.mulf %287, %285 : vector<8x128xf32>
    %289 = arith.mulf %279, %254 : vector<8x128xf32>
    %290 = arith.addf %288, %289 : vector<8x128xf32>
    %291 = arith.index_cast %c7_i32 : i32 to index
    %c0_82 = arith.constant 0 : index
    %c0_83 = arith.constant 0 : index
    %292 = vector.load %arg9[%291, %c0_82, %c0_83] : memref<8x8x128xf32, #tpu.memory_space<vmem>>, vector<1x8x128xf32>
    %293 = vector.shape_cast %292 : vector<1x8x128xf32> to vector<8x128xf32>
    %294 = vector.shape_cast %290 : vector<8x128xf32> to vector<1x8x128xf32>
    tpu.vector_store %arg9[%291, %c0_82, %c0_83], %294 {strides = array<i32>} : memref<8x8x128xf32, #tpu.memory_space<vmem>>, vector<1x8x128xf32>,
    %c8_i32 = arith.constant 8 : i32
    %c0_84 = arith.constant 0 : index
    %c0_85 = arith.constant 0 : index
    %295 = vector.load %arg8[%c0_84, %c0_85] : memref<8x128xf32, #tpu.memory_space<vmem>>, vector<8x128xf32>
    tpu.vector_store %arg8[%c0_84, %c0_85], %290 {strides = array<i32>} : memref<8x128xf32, #tpu.memory_space<vmem>>, vector<8x128xf32>,
    %c0_86 = arith.constant 0 : index
    %c0_87 = arith.constant 0 : index
    %c0_88 = arith.constant 0 : index
    %296 = vector.load %arg9[%c0_86, %c0_87, %c0_88] : memref<8x8x128xf32, #tpu.memory_space<vmem>>, vector<8x8x128xf32>
    %297 = vector.shape_cast %296 : vector<8x8x128xf32> to vector<64x128xf32>
    %c0_89 = arith.constant 0 : index
    %c0_90 = arith.constant 0 : index
    %298 = vector.load %arg5[%c0_89, %c0_90] : memref<128x2xf32, #tpu.memory_space<vmem>>, vector<128x2xf32>
    %cst_91 = arith.constant dense<0.000000e+00> : vector<64x2xf32>
    %299 = tpu.matmul %297, %298, %cst_91 {dimension_numbers = #tpu.dot_dimension_numbers<[1], [0], [0], [1], [0, 0, 1, 1], [], []>} : vector<64x128xf32>, vector<128x2xf32>, vector<64x2xf32> -> vector<64x2xf32>
    %c0_92 = arith.constant 0 : index
    %c0_93 = arith.constant 0 : index
    %300 = vector.load %arg6[%c0_92, %c0_93] : memref<1x2xf32, #tpu.memory_space<vmem>>, vector<1x2xf32>
    %301 = vector.broadcast %300 : vector<1x2xf32> to vector<64x2xf32>
    %302 = arith.addf %299, %301 : vector<64x2xf32>
    %303 = vector.shape_cast %302 : vector<64x2xf32> to vector<8x8x2xf32>
    %c0_94 = arith.constant 0 : index
    %c0_95 = arith.constant 0 : index
    %c0_96 = arith.constant 0 : index
    %304 = vector.load %arg7[%c0_94, %c0_95, %c0_96] : memref<8x8x2xf32, #tpu.memory_space<vmem>>, vector<8x8x2xf32>
    tpu.vector_store %arg7[%c0_94, %c0_95, %c0_96], %303 {strides = array<i32>} : memref<8x8x2xf32, #tpu.memory_space<vmem>>, vector<8x8x2xf32>,
    return
  }
  func.func @transform_0(%arg0: i32) -> (i32, i32) {
    %c0_i32 = arith.constant 0 : i32
    %c0_i32_0 = arith.constant 0 : i32
    %c0_i32_1 = arith.constant 0 : i32
    return %c0_i32, %c0_i32_0 : i32, i32
  }
  func.func @transform_1(%arg0: i32) -> (i32, i32, i32) {
    %c0_i32 = arith.constant 0 : i32
    %c0_i32_0 = arith.constant 0 : i32
    %c0_i32_1 = arith.constant 0 : i32
    return %arg0, %c0_i32, %c0_i32_0 : i32, i32, i32
  }
  func.func @transform_2(%arg0: i32) -> (i32, i32) {
    %c0_i32 = arith.constant 0 : i32
    %c0_i32_0 = arith.constant 0 : i32
    %c0_i32_1 = arith.constant 0 : i32
    return %c0_i32, %c0_i32_0 : i32, i32
  }
  func.func @transform_3(%arg0: i32) -> (i32, i32) {
    %c0_i32 = arith.constant 0 : i32
    %c0_i32_0 = arith.constant 0 : i32
    %c0_i32_1 = arith.constant 0 : i32
    return %c0_i32, %c0_i32_0 : i32, i32
  }
  func.func @transform_4(%arg0: i32) -> (i32, i32) {
    %c0_i32 = arith.constant 0 : i32
    %c0_i32_0 = arith.constant 0 : i32
    %c0_i32_1 = arith.constant 0 : i32
    return %c0_i32, %c0_i32_0 : i32, i32
  }
  func.func @transform_5(%arg0: i32) -> (i32, i32) {
    %c0_i32 = arith.constant 0 : i32
    %c0_i32_0 = arith.constant 0 : i32
    %c0_i32_1 = arith.constant 0 : i32
    return %c0_i32, %c0_i32_0 : i32, i32
  }
  func.func @transform_6(%arg0: i32) -> (i32, i32, i32) {
    %c0_i32 = arith.constant 0 : i32
    %c0_i32_0 = arith.constant 0 : i32
    %c0_i32_1 = arith.constant 0 : i32
    return %arg0, %c0_i32, %c0_i32_0 : i32, i32, i32
  }
}

</mosaic_0001>

<bundles_post_ra>
// kernel: tpu_custom_call.1
= control target key start
LH: loop header
LB: loop body
LE: loop exit
PB: predicated region body
PF: predicated region fallthrough
CT: control target
= control target key end

     0   :  { %11 = vsyncpa [#allocation5], 0  ;;  %s3659_s0 = inlined_call_operand.vmem [shape: f32[8,128], index: 0, kind: input, shape index: {}]   ;;  %s3660_s1 = inlined_call_operand.hbm [shape: f32[8,8,384], index: 1, kind: input, shape index: {}]   ;;  %s3661_s2 = inlined_call_operand.hbm [shape: f32[128,384], index: 2, kind: input, shape index: {}]   ;;  %s3662_s3 = inlined_call_operand.vmem [shape: f32[1,128], index: 3, kind: input, shape index: {}]   ;;  %s3663_s4 = inlined_call_operand.vmem [shape: f32[128,2], index: 4, kind: input, shape index: {}]   ;;  %s3664_s5 = inlined_call_operand.vmem [shape: f32[1,2], index: 5, kind: input, shape index: {}]   ;;  %s3665_s6 = inlined_call_operand.vmem [shape: f32[8,8,2], index: 6, kind: output, shape index: {}]  }
   0x1   :  { %12 = vsyncpa [#allocation7], 0  ;;  %s3069_s21 = smov [#allocation4]   ;;  %s3021_s25 = scalar_lea.hbm %s3660_s1, 3072 }
   0x2   :  { %s20_s22 = sshll.u32 %s3069_s21, 4  ;;  %p3022_p0 = scmp.ne.s32.totalorder %s3660_s1, %s3021_s25  ;;  %s21_s22 = int_to_ptr.vmem [resolvable:$true] %s20_s22 }
   0x3   :  { %p3025_p1 = scmp.lt.u32.totalorder %s3021_s25, %s3660_s1 }
   0x5   :  { %p3027_p2 = pnand %p3025_p1, %p3022_p0 }
   0x7   :  { %3030 = shalt.err (!%p3027_p2)
}
   0x8   :  { %s3031_s30 = scalar_lea.vmem %s21_s22, 3072  ;;  %p3036_p4 = scmp.lt.s32.totalorder %s21_s22, %s21_s22 }
   0x9   :  { %p3032_p3 = scmp.ne.s32.totalorder %s21_s22, %s3031_s30  ;;  %p3037_p5 = scmp.lt.s32.totalorder %s3031_s30, %s3031_s30 }
   0xb   :  { %p3038_p6 = por %p3037_p5, %p3036_p4 }
   0xd   :  { %p3039_p7 = pnand %p3038_p6, %p3032_p3 }
   0xf   :  { %3042 = shalt.err (!%p3039_p7)
}
  0x10   :  { %s3070_s7 = smov 384   ;;  %s3071_s8 = smov 24  }
  0x11   :  { %26 = dma.hbm_to_vmem [thread:$0]  %s3660_s1, 3072, %s21_s22, [#allocation5], %s3070_s7, %s3070_s7, %s3071_s8  }
  0x12   :  { %s3072_s11 = smov [#allocation6]   ;;  %s3043_s15 = scalar_lea.hbm %s3661_s2, 6144 }
  0x13   :  { %s32_s12 = sshll.u32 %s3072_s11, 4  ;;  %p3044_p8 = scmp.ne.s32.totalorder %s3661_s2, %s3043_s15  ;;  %s33_s12 = int_to_ptr.vmem [resolvable:$true] %s32_s12 }
  0x14   :  { %p3047_p9 = scmp.lt.u32.totalorder %s3043_s15, %s3661_s2 }
  0x16   :  { %p3049_p10 = pnand %p3047_p9, %p3044_p8 }
  0x18   :  { %3052 = shalt.err (!%p3049_p10)
}
  0x19   :  { %s3053_s20 = scalar_lea.vmem %s33_s12, 6144  ;;  %p3058_p12 = scmp.lt.s32.totalorder %s33_s12, %s33_s12 }
  0x1a   :  { %p3054_p11 = scmp.ne.s32.totalorder %s33_s12, %s3053_s20  ;;  %p3059_p13 = scmp.lt.s32.totalorder %s3053_s20, %s3053_s20 }
  0x1c   :  { %p3060_p0 = por %p3059_p13, %p3058_p12 }
  0x1e   :  { %p3061_p1 = pnand %p3060_p0, %p3054_p11 }
  0x20   :  { %3064 = shalt.err (!%p3061_p1)
}
  0x21   :  { %38 = dma.hbm_to_vmem [thread:$0]  %s3661_s2, 6144, %s33_s12, [#allocation7], %s3070_s7, %s3070_s7, %s3071_s8  }
  0x22   :  { %3065 = dma.done.wait [#allocation5], 3072  }
  0x23   :  { %3066 = vsyncadd [#allocation5], 4294964224 }
  0x24   :  { %3067 = dma.done.wait [#allocation7], 6144  }
  0x25   :  { %3068 = vsyncadd [#allocation7], 4294961152  ;;  %v3073_v0 = vmov 0.0   ;;  %v69_v1 = vld [vmem:[#allocation6 + $0x8] sm:$0xff]  ;;  %v72_v2 = vld [vmem:[#allocation6 + $0x20] sm:$0xff]  ;;  %v3074_v53 = vmov 0.0|0.0  }
  0x26   :  { %180 = vmatprep.mubr.f32.mxu1 %v3073_v0  ;;  %396 = vmatprep.mubr.f32.mxu0 %v3073_v0  ;;  %v68_v3 = vld [vmem:[#allocation6] sm:$0xff]  ;;  %v3137_v4 = vpack.c.bf16 %v72_v2, %v69_v1  ;;  %v71_v5 = vld [vmem:[#allocation6 + $0x18] sm:$0xff]  ;;  %v78_v7 = vld [vmem:[#allocation6 + $0x50] sm:$0xff]  ;;  %vm3075_vm0 = vmmov 0   ;;  %vm1936_vm1 = vcmask 15360  }
  0x27   :  { %v75_v6 = vld [vmem:[#allocation6 + $0x38] sm:$0xff]  ;;  %v3139_v8 = vpack.c.bf16 %v71_v5, %v68_v3  ;;  %v74_v10 = vld [vmem:[#allocation6 + $0x30] sm:$0xff]  ;;  %v77_v11 = vld [vmem:[#allocation6 + $0x48] sm:$0xff] }
  0x28   :  { %v3141_v9 = vpack.c.bf16 %v78_v7, %v75_v6  ;;  %v81_v12 = vld [vmem:[#allocation6 + $0x68] sm:$0xff]  ;;  %2454 = vmatprep.subr.bf16.mxu1 %v3137_v4  ;;  %v84_v13 = vld [vmem:[#allocation6 + $0x80] sm:$0xff]  ;;  %2510 = vmatprep.subr.bf16.mxu0 %v3137_v4  ;;  %v3146_v14 = vpack.c.bf16 %v77_v11, %v74_v10  ;;  %v83_v17 = vld [vmem:[#allocation6 + $0x78] sm:$0xff] }
  0x29   :  { %2456 = vmatpush1.bf16.msra.mxu1 %v3139_v8  ;;  %2512 = vmatpush1.bf16.msra.mxu0 %v3139_v8  ;;  %v3150_v15 = vpack.c.bf16 %v84_v13, %v81_v12  ;;  %v80_v16 = vld [vmem:[#allocation6 + $0x60] sm:$0xff]  ;;  %v87_v18 = vld [vmem:[#allocation6 + $0x98] sm:$0xff]  ;;  %v90_v19 = vld [vmem:[#allocation6 + $0xb0] sm:$0xff] }
  0x2a   :  { %2458 = vmatprep.subr.bf16.mxu1 %v3141_v9  ;;  %2514 = vmatprep.subr.bf16.mxu0 %v3141_v9  ;;  %v3154_v20 = vpack.c.bf16 %v83_v17, %v80_v16  ;;  %v3158_v21 = vpack.c.bf16 %v90_v19, %v87_v18  ;;  %v86_v22 = vld [vmem:[#allocation6 + $0x90] sm:$0xff]  ;;  %v89_v23 = vld [vmem:[#allocation6 + $0xa8] sm:$0xff]  ;;  %v96_v25 = vld [vmem:[#allocation6 + $0xe0] sm:$0xff] }
  0x2b   :  { %v93_v24 = vld [vmem:[#allocation6 + $0xc8] sm:$0xff]  ;;  %v3162_v26 = vpack.c.bf16 %v89_v23, %v86_v22  ;;  %v92_v28 = vld [vmem:[#allocation6 + $0xc0] sm:$0xff]  ;;  %v95_v29 = vld [vmem:[#allocation6 + $0xd8] sm:$0xff] }
  0x2c   :  { %v3166_v27 = vpack.c.bf16 %v96_v25, %v93_v24  ;;  %v99_v30 = vld [vmem:[#allocation6 + $0xf8] sm:$0xff]  ;;  %v102_v31 = vld [vmem:[#allocation6 + $0x110] sm:$0xff]  ;;  %v3170_v32 = vpack.c.bf16 %v95_v29, %v92_v28  ;;  %v101_v35 = vld [vmem:[#allocation6 + $0x108] sm:$0xff] }
  0x2d   :  { %2460 = vmatpush1.bf16.msra.mxu1 %v3146_v14  ;;  %2516 = vmatpush1.bf16.msra.mxu0 %v3146_v14  ;;  %v3174_v33 = vpack.c.bf16 %v102_v31, %v99_v30  ;;  %v98_v34 = vld [vmem:[#allocation6 + $0xf0] sm:$0xff]  ;;  %v105_v36 = vld [vmem:[#allocation6 + $0x128] sm:$0xff]  ;;  %v108_v37 = vld [vmem:[#allocation6 + $0x140] sm:$0xff] }
  0x2e   :  { %2462 = vmatprep.subr.bf16.mxu1 %v3150_v15  ;;  %2518 = vmatprep.subr.bf16.mxu0 %v3150_v15  ;;  %v3178_v38 = vpack.c.bf16 %v101_v35, %v98_v34  ;;  %v3182_v39 = vpack.c.bf16 %v108_v37, %v105_v36  ;;  %v104_v40 = vld [vmem:[#allocation6 + $0x120] sm:$0xff]  ;;  %v107_v41 = vld [vmem:[#allocation6 + $0x138] sm:$0xff]  ;;  %v114_v43 = vld [vmem:[#allocation6 + $0x170] sm:$0xff] }
  0x2f   :  { %v111_v42 = vld [vmem:[#allocation6 + $0x158] sm:$0xff]  ;;  %v3186_v44 = vpack.c.bf16 %v107_v41, %v104_v40  ;;  %v110_v46 = vld [vmem:[#allocation6 + $0x150] sm:$0xff]  ;;  %v113_v47 = vld [vmem:[#allocation6 + $0x168] sm:$0xff] }
  0x30   :  { %v3190_v45 = vpack.c.bf16 %v114_v43, %v111_v42  ;;  %v3194_v48 = vpack.c.bf16 %v113_v47, %v110_v46  ;;  %v70_v49 = vld [vmem:[#allocation6 + $0x10] sm:$0xff]  ;;  %v73_v50 = vld [vmem:[#allocation6 + $0x28] sm:$0xff]  ;;  %v3203_v51 = vld [vmem:[%s3659_s0] sm:$0xff] }
  0x31   :  { %2464 = vmatpush1.bf16.msra.mxu1 %v3154_v20  ;;  %2520 = vmatpush1.bf16.msra.mxu0 %v3154_v20  ;;  %v3205_v52 = vpack.c.bf16 %v73_v50, %v70_v49  ;;  %v76_v54 = vld [vmem:[#allocation6 + $0x40] sm:$0xff]  ;;  %v79_v55 = vld [vmem:[#allocation6 + $0x58] sm:$0xff]  ;;  %v82_v57 = vld [vmem:[#allocation6 + $0x70] sm:$0xff] }
  0x32   :  { %2466 = vmatprep.subr.bf16.mxu1 %v3158_v21  ;;  %2522 = vmatprep.subr.bf16.mxu0 %v3158_v21  ;;  %v3212_v56 = vpack.c.bf16 %v79_v55, %v76_v54  ;;  %v85_v58 = vld [vmem:[#allocation6 + $0x88] sm:$0xff]  ;;  %v88_v60 = vld [vmem:[#allocation6 + $0xa0] sm:$0xff]  ;;  %v91_v61 = vld [vmem:[#allocation6 + $0xb8] sm:$0xff] }
  0x33   :  { %v3218_v59 = vpack.c.bf16 %v85_v58, %v82_v57  ;;  %v3222_v62 = vpack.c.bf16 %v91_v61, %v88_v60  ;;  %v94_v63 = vld [vmem:[#allocation6 + $0xd0] sm:$0xff]  ;;  %v97_v1 = vld [vmem:[#allocation6 + $0xe8] sm:$0xff]  ;;  %v100_v3 = vld [vmem:[#allocation6 + $0x100] sm:$0xff] }
  0x34   :  { %v3226_v2 = vpack.c.bf16 %v97_v1, %v94_v63  ;;  %v103_v5 = vld [vmem:[#allocation6 + $0x118] sm:$0xff]  ;;  %v106_v7 = vld [vmem:[#allocation6 + $0x130] sm:$0xff]  ;;  %v109_v10 = vld [vmem:[#allocation6 + $0x148] sm:$0xff] }
  0x35   :  { %2468 = vmatpush1.bf16.msra.mxu1 %v3162_v26  ;;  %2524 = vmatpush1.bf16.msra.mxu0 %v3162_v26  ;;  %v3230_v6 = vpack.c.bf16 %v103_v5, %v100_v3  ;;  %v3234_v11 = vpack.c.bf16 %v109_v10, %v106_v7  ;;  %v112_v12 = vld [vmem:[#allocation6 + $0x160] sm:$0xff]  ;;  %v115_v13 = vld [vmem:[#allocation6 + $0x178] sm:$0xff]  ;;  %v66_v24 = vld [vmem:[#allocation4 + $0x8] sm:$0xff] }
  0x36   :  { %2470 = vmatprep.subr.bf16.mxu1 %v3166_v27  ;;  %2526 = vmatprep.subr.bf16.mxu0 %v3166_v27  ;;  %v3238_v16 = vpack.c.bf16 %v115_v13, %v112_v12  ;;  %v65_v17 = vld [vmem:[#allocation4] sm:$0xff]  ;;  %v67_v42 = vld [vmem:[#allocation4 + $0x10] sm:$0xff] }
  0x37   :  { %v3265_v34 = vld [vmem:[%s3662_s3] ss:$0 sm:$0xff] }
  0x38   :  { %v282_v63 = vld [vmem:[#allocation4 + $0x20] sm:$0xff] }
  0x39   :  { %2472 = vmatpush1.bf16.msra.mxu1 %v3170_v32  ;;  %2528 = vmatpush1.bf16.msra.mxu0 %v3170_v32 }
  0x3a   :  { %2474 = vmatprep.subr.bf16.mxu1 %v3174_v33  ;;  %2530 = vmatprep.subr.bf16.mxu0 %v3174_v33 }
  0x3d   :  { %2476 = vmatpush1.bf16.msra.mxu1 %v3178_v38  ;;  %2532 = vmatpush1.bf16.msra.mxu0 %v3178_v38 }
  0x3e   :  { %2478 = vmatprep.subr.bf16.mxu1 %v3182_v39  ;;  %2534 = vmatprep.subr.bf16.mxu0 %v3182_v39 }
  0x41   :  { %2480 = vmatpush1.bf16.msra.mxu1 %v3186_v44  ;;  %2536 = vmatpush1.bf16.msra.mxu0 %v3186_v44 }
  0x42   :  { %2482 = vmatprep.subr.bf16.mxu1 %v3190_v45  ;;  %2538 = vmatprep.subr.bf16.mxu0 %v3190_v45 }
  0x45   :  { %2484 = vmatpush1.bf16.msra.mxu1 %v3194_v48  ;;  %2540 = vmatpush1.bf16.msra.mxu0 %v3194_v48 }
  0x46   :  { %2485 = vmatprep.subr.bf16.mxu1 %v3074_v53  ;;  %2566 = vmatprep.subr.bf16.mxu0 %v3137_v4 }
  0x48   :  { %181 = vmatmul.mubr.f32.vlgmr.msra.gmra.mrb[0].mxu1 %v3203_v51 }
  0x49   :  { %2487 = vmatpush3.bf16.msra.mxu1 %v3205_v52  ;;  %2161 = vmatprep.mubr.msk.f32.mxu1 %vm3075_vm0, %v3073_v0 }
  0x4a   :  { %2488 = vmatprep.subr.bf16.mxu1 %v3074_v53 }
  0x4d   :  { %2490 = vmatpush3.bf16.msra.mxu1 %v3212_v56 }
  0x4e   :  { %2491 = vmatprep.subr.bf16.mxu1 %v3074_v53 }
  0x51   :  { %2493 = vmatpush3.bf16.msra.mxu1 %v3218_v59 }
  0x52   :  { %2494 = vmatprep.subr.bf16.mxu1 %v3074_v53 }
  0x55   :  { %2496 = vmatpush3.bf16.msra.mxu1 %v3222_v62 }
  0x56   :  { %2497 = vmatprep.subr.bf16.mxu1 %v3074_v53 }
  0x59   :  { %2499 = vmatpush3.bf16.msra.mxu1 %v3226_v2 }
  0x5a   :  { %2500 = vmatprep.subr.bf16.mxu1 %v3074_v53 }
  0x5d   :  { %2502 = vmatpush3.bf16.msra.mxu1 %v3230_v6 }
  0x5e   :  { %2503 = vmatprep.subr.bf16.mxu1 %v3074_v53 }
  0x61   :  { %2505 = vmatpush3.bf16.msra.mxu1 %v3234_v11 }
  0x62   :  { %2506 = vmatprep.subr.bf16.mxu1 %v3074_v53 }
  0x65   :  { %2508 = vmatpush3.bf16.msra.mxu1 %v3238_v16 }
  0x66   :  { %2541 = vmatprep.subr.bf16.mxu1 %v3074_v53 }
  0x68   :  { %2162 = vmatmul.mubr.f32.vlgmr.msra.gmra.mrb[2].mxu1 %v3203_v51 }
  0x69   :  { %2543 = vmatpush3.bf16.msra.mxu1 %v3205_v52  ;;  %2196 = vmatprep.mubr.msk.f32.mxu1 %vm3075_vm0, %v3073_v0 }
  0x6a   :  { %2544 = vmatprep.subr.bf16.mxu1 %v3074_v53 }
  0x6d   :  { %2546 = vmatpush3.bf16.msra.mxu1 %v3212_v56 }
  0x6e   :  { %2547 = vmatprep.subr.bf16.mxu1 %v3074_v53 }
  0x71   :  { %2549 = vmatpush3.bf16.msra.mxu1 %v3218_v59 }
  0x72   :  { %2550 = vmatprep.subr.bf16.mxu1 %v3074_v53 }
  0x75   :  { %2552 = vmatpush3.bf16.msra.mxu1 %v3222_v62 }
  0x76   :  { %2553 = vmatprep.subr.bf16.mxu1 %v3074_v53 }
  0x79   :  { %2555 = vmatpush3.bf16.msra.mxu1 %v3226_v2 }
  0x7a   :  { %2556 = vmatprep.subr.bf16.mxu1 %v3074_v53 }
  0x7d   :  { %2558 = vmatpush3.bf16.msra.mxu1 %v3230_v6 }
  0x7e   :  { %2559 = vmatprep.subr.bf16.mxu1 %v3074_v53 }
  0x81   :  { %2561 = vmatpush3.bf16.msra.mxu1 %v3234_v11 }
  0x82   :  { %2562 = vmatprep.subr.bf16.mxu1 %v3074_v53 }
  0x85   :  { %2564 = vmatpush3.bf16.msra.mxu1 %v3238_v16 }
  0x86   :  { %2597 = vmatprep.subr.bf16.mxu1 %v3074_v53 }
 0x11b   :  { %v182_v18 = vpop.f32.mrb[0].mxu1 }
 0x11c   :  { %v257_v19 = vadd.f32 %v182_v18, %v65_v17  ;;  %v184_v22 = vpop.f32.mrb[1].mxu1 }
 0x11d   :  { %v264_v25 = vadd.f32 %v184_v22, %v66_v24  ;;  %v283_v22 = vld [vmem:[#allocation4 + $0x28] sm:$0xff] }
 0x11e   :  { %v1952_v23 = vmul.f32 -1.442695, %v257_v19 }
 0x11f   :  { %v1953_v28 = vmul.f32 -1.442695, %v264_v25 }
 0x120   :  { %2940 = vpow2.f32 %v1952_v23 }
 0x121   :  { %2942 = vpow2.f32 %v1953_v28 }
 0x12a   :  { %v2941_v29 = vpop.eup %2940 }
 0x12b   :  { %v261_v30 = vadd.f32 1.0, %v2941_v29  ;;  %v2943_v31 = vpop.eup %2942 }
 0x12c   :  { %v268_v35 = vadd.f32 1.0, %v2943_v31 }
 0x12d   :  { %2944 = vrcp.f32 %v261_v30 }
 0x12e   :  { %2946 = vrcp.f32 %v268_v35 }
 0x137   :  { %v2945_v41 = vpop.eup %2944 }
 0x138   :  { %v2947_v47 = vpop.eup %2946 }
 0x139   :  { %v275_v49 = vsub.f32 1.0, %v2947_v47  ;;  %v277_v55 = vmul.f32 %v2947_v47, %v3203_v51  ;;  %v281_v51 = vld [vmem:[#allocation4 + $0x18] sm:$0xff] }
 0x13b   :  { %v253_v36 = vpop.f32.mrb[2].mxu1 }
 0x13c   :  { %v271_v37 = vadd.f32 %v3265_v34, %v253_v36  ;;  %v2163_v40 = vpop.f32.mrb[3].mxu1 }
 0x13e   :  { %v272_v43 = vmul.f32 %v2945_v41, %v271_v37 }
 0x140   :  { %v273_v46 = vadd.f32 %v272_v43, %v67_v42 }
 0x142   :  { %2948 = vtanh.f32 %v273_v46 }
 0x14c   :  { %v2949_v50 = vpop.eup %2948 }
 0x14d   :  { %v276_v54 = vmul.f32 %v2949_v50, %v275_v49  ;;  %v935_v50 = vld [vmem:[#allocation6] sm:$0xff] }
 0x14f   :  { %v3269_v57 = vadd.f32 %v277_v55, %v276_v54 }
 0x151   :  { %397 = vmatmul.mubr.f32.vlgmr.msra.gmra.mrb[0].mxu0 %v3269_v57  ;;  %2197 = vmatmul.mubr.f32.vlgmr.msra.gmra.mrb[4].mxu1 %v3269_v57 }
 0x152   :  { %2568 = vmatpush1.bf16.msra.mxu0 %v3139_v8  ;;  %2599 = vmatpush3.bf16.msra.mxu1 %v3205_v52 }
 0x153   :  { %2570 = vmatprep.subr.bf16.mxu0 %v3141_v9  ;;  %2600 = vmatprep.subr.bf16.mxu1 %v3074_v53 }
 0x154   :  { %613 = vmatprep.mubr.f32.mxu0 %v3073_v0  ;;  %2231 = vmatprep.mubr.msk.f32.mxu1 %vm3075_vm0, %v3073_v0 }
 0x156   :  { %2572 = vmatpush1.bf16.msra.mxu0 %v3146_v14  ;;  %2602 = vmatpush3.bf16.msra.mxu1 %v3212_v56 }
 0x157   :  { %2574 = vmatprep.subr.bf16.mxu0 %v3150_v15  ;;  %2603 = vmatprep.subr.bf16.mxu1 %v3074_v53 }
 0x15a   :  { %2576 = vmatpush1.bf16.msra.mxu0 %v3154_v20  ;;  %2605 = vmatpush3.bf16.msra.mxu1 %v3218_v59 }
 0x15b   :  { %2578 = vmatprep.subr.bf16.mxu0 %v3158_v21  ;;  %2606 = vmatprep.subr.bf16.mxu1 %v3074_v53 }
 0x15e   :  { %2580 = vmatpush1.bf16.msra.mxu0 %v3162_v26  ;;  %2608 = vmatpush3.bf16.msra.mxu1 %v3222_v62 }
 0x15f   :  { %2582 = vmatprep.subr.bf16.mxu0 %v3166_v27  ;;  %2609 = vmatprep.subr.bf16.mxu1 %v3074_v53 }
 0x162   :  { %2584 = vmatpush1.bf16.msra.mxu0 %v3170_v32  ;;  %2611 = vmatpush3.bf16.msra.mxu1 %v3226_v2 }
 0x163   :  { %2586 = vmatprep.subr.bf16.mxu0 %v3174_v33  ;;  %2612 = vmatprep.subr.bf16.mxu1 %v3074_v53 }
 0x166   :  { %2588 = vmatpush1.bf16.msra.mxu0 %v3178_v38  ;;  %2614 = vmatpush3.bf16.msra.mxu1 %v3230_v6 }
 0x167   :  { %2590 = vmatprep.subr.bf16.mxu0 %v3182_v39  ;;  %2615 = vmatprep.subr.bf16.mxu1 %v3074_v53 }
 0x16a   :  { %2592 = vmatpush1.bf16.msra.mxu0 %v3186_v44  ;;  %2617 = vmatpush3.bf16.msra.mxu1 %v3234_v11 }
 0x16b   :  { %2594 = vmatprep.subr.bf16.mxu0 %v3190_v45  ;;  %2618 = vmatprep.subr.bf16.mxu1 %v3074_v53 }
 0x16e   :  { %2596 = vmatpush1.bf16.msra.mxu0 %v3194_v48  ;;  %2620 = vmatpush3.bf16.msra.mxu1 %v3238_v16 }
 0x16f   :  { %2622 = vmatprep.subr.bf16.mxu0 %v3137_v4  ;;  %2653 = vmatprep.subr.bf16.mxu1 %v3074_v53 }
 0x224   :  { %v398_v58 = vpop.f32.mrb[0].mxu0  ;;  %v469_v60 = vpop.f32.mrb[4].mxu1 }
 0x225   :  { %v473_v61 = vadd.f32 %v398_v58, %v281_v51  ;;  %v400_v1 = vpop.f32.mrb[1].mxu0  ;;  %v2198_v3 = vpop.f32.mrb[5].mxu1  ;;  %v487_v4 = vadd.f32 %v3265_v34, %v469_v60  ;;  %v941_v51 = vld [vmem:[#allocation6 + $0x30] sm:$0xff]  ;;  %v948_v60 = vld [vmem:[#allocation6 + $0x68] sm:$0xff] }
 0x226   :  { %v480_v7 = vadd.f32 %v400_v1, %v282_v63  ;;  %v947_v1 = vld [vmem:[#allocation6 + $0x60] sm:$0xff]  ;;  %v950_v3 = vld [vmem:[#allocation6 + $0x78] sm:$0xff] }
 0x227   :  { %v1954_v5 = vmul.f32 -1.442695, %v473_v61  ;;  %v951_v61 = vld [vmem:[#allocation6 + $0x80] sm:$0xff] }
 0x228   :  { %v1955_v10 = vmul.f32 -1.442695, %v480_v7  ;;  %v3381_v63 = vpack.c.bf16 %v951_v61, %v948_v60  ;;  %v954_v7 = vld [vmem:[#allocation6 + $0x98] sm:$0xff] }
 0x229   :  { %2950 = vpow2.f32 %v1954_v5  ;;  %v3383_v5 = vpack.c.bf16 %v950_v3, %v947_v1 }
 0x22a   :  { %2952 = vpow2.f32 %v1955_v10  ;;  %v957_v10 = vld [vmem:[#allocation6 + $0xb0] sm:$0xff] }
 0x233   :  { %v2951_v12 = vpop.eup %2950 }
 0x234   :  { %v477_v13 = vadd.f32 1.0, %v2951_v12  ;;  %v2953_v17 = vpop.eup %2952  ;;  %v3387_v12 = vpack.c.bf16 %v957_v10, %v954_v7  ;;  %v717_v7 = vld [vmem:[#allocation4 + $0x58] sm:$0xff] }
 0x235   :  { %v484_v18 = vadd.f32 1.0, %v2953_v17  ;;  %v956_v17 = vld [vmem:[#allocation6 + $0xa8] sm:$0xff] }
 0x236   :  { %2954 = vrcp.f32 %v477_v13  ;;  %v953_v13 = vld [vmem:[#allocation6 + $0x90] sm:$0xff] }
 0x237   :  { %2956 = vrcp.f32 %v484_v18  ;;  %v3389_v18 = vpack.c.bf16 %v956_v17, %v953_v13 }
 0x240   :  { %v2955_v19 = vpop.eup %2954 }
 0x241   :  { %v488_v23 = vmul.f32 %v2955_v19, %v487_v4  ;;  %v2957_v25 = vpop.eup %2956  ;;  %v960_v4 = vld [vmem:[#allocation6 + $0xc8] sm:$0xff]  ;;  %v963_v19 = vld [vmem:[#allocation6 + $0xe0] sm:$0xff] }
 0x242   :  { %v491_v28 = vsub.f32 1.0, %v2957_v25  ;;  %v493_v31 = vmul.f32 %v2957_v25, %v3269_v57 }
 0x243   :  { %v489_v24 = vadd.f32 %v488_v23, %v283_v22  ;;  %v3393_v22 = vpack.c.bf16 %v963_v19, %v960_v4  ;;  %v959_v23 = vld [vmem:[#allocation6 + $0xc0] sm:$0xff] }
 0x245   :  { %2958 = vtanh.f32 %v489_v24  ;;  %v962_v24 = vld [vmem:[#allocation6 + $0xd8] sm:$0xff] }
 0x246   :  { %v3395_v25 = vpack.c.bf16 %v962_v24, %v959_v23 }
 0x24f   :  { %v2959_v29 = vpop.eup %2958 }
 0x250   :  { %v492_v30 = vmul.f32 %v2959_v29, %v491_v28  ;;  %v966_v28 = vld [vmem:[#allocation6 + $0xf8] sm:$0xff]  ;;  %v969_v29 = vld [vmem:[#allocation6 + $0x110] sm:$0xff] }
 0x252   :  { %v3310_v35 = vadd.f32 %v493_v31, %v492_v30  ;;  %v965_v30 = vld [vmem:[#allocation6 + $0xf0] sm:$0xff]  ;;  %v3399_v31 = vpack.c.bf16 %v969_v29, %v966_v28 }
 0x253   :  { %v1154_v29 = vld [vmem:[#allocation6 + $0x10] sm:$0xff] }
 0x254   :  { %614 = vmatmul.mubr.f32.vlgmr.msra.gmra.mrb[2].mxu0 %v3310_v35  ;;  %2232 = vmatmul.mubr.f32.vlgmr.msra.gmra.mrb[6].mxu1 %v3310_v35 }
 0x255   :  { %2624 = vmatpush1.bf16.msra.mxu0 %v3139_v8  ;;  %2655 = vmatpush3.bf16.msra.mxu1 %v3205_v52  ;;  %v498_v8 = vld [vmem:[#allocation4 + $0x30] sm:$0xff] }
 0x256   :  { %2626 = vmatprep.subr.bf16.mxu0 %v3141_v9  ;;  %2656 = vmatprep.subr.bf16.mxu1 %v3074_v53 }
 0x257   :  { %830 = vmatprep.mubr.f32.mxu0 %v3073_v0  ;;  %2266 = vmatprep.mubr.msk.f32.mxu1 %vm3075_vm0, %v3073_v0 }
 0x259   :  { %2628 = vmatpush1.bf16.msra.mxu0 %v3146_v14  ;;  %2658 = vmatpush3.bf16.msra.mxu1 %v3212_v56 }
 0x25a   :  { %2630 = vmatprep.subr.bf16.mxu0 %v3150_v15  ;;  %2659 = vmatprep.subr.bf16.mxu1 %v3074_v53 }
 0x25d   :  { %2632 = vmatpush1.bf16.msra.mxu0 %v3154_v20  ;;  %2661 = vmatpush3.bf16.msra.mxu1 %v3218_v59  ;;  %v499_v20 = vld [vmem:[#allocation4 + $0x38] sm:$0xff] }
 0x25e   :  { %2634 = vmatprep.subr.bf16.mxu0 %v3158_v21  ;;  %2662 = vmatprep.subr.bf16.mxu1 %v3074_v53 }
 0x261   :  { %2636 = vmatpush1.bf16.msra.mxu0 %v3162_v26  ;;  %2664 = vmatpush3.bf16.msra.mxu1 %v3222_v62 }
 0x262   :  { %2638 = vmatprep.subr.bf16.mxu0 %v3166_v27  ;;  %2665 = vmatprep.subr.bf16.mxu1 %v3074_v53 }
 0x265   :  { %2640 = vmatpush1.bf16.msra.mxu0 %v3170_v32  ;;  %2667 = vmatpush3.bf16.msra.mxu1 %v3226_v2 }
 0x266   :  { %2642 = vmatprep.subr.bf16.mxu0 %v3174_v33  ;;  %2668 = vmatprep.subr.bf16.mxu1 %v3074_v53 }
 0x269   :  { %2644 = vmatpush1.bf16.msra.mxu0 %v3178_v38  ;;  %2670 = vmatpush3.bf16.msra.mxu1 %v3230_v6 }
 0x26a   :  { %2646 = vmatprep.subr.bf16.mxu0 %v3182_v39  ;;  %2671 = vmatprep.subr.bf16.mxu1 %v3074_v53 }
 0x26d   :  { %2648 = vmatpush1.bf16.msra.mxu0 %v3186_v44  ;;  %2673 = vmatpush3.bf16.msra.mxu1 %v3234_v11 }
 0x26e   :  { %2650 = vmatprep.subr.bf16.mxu0 %v3190_v45  ;;  %2674 = vmatprep.subr.bf16.mxu1 %v3074_v53 }
 0x271   :  { %2652 = vmatpush1.bf16.msra.mxu0 %v3194_v48  ;;  %2676 = vmatpush3.bf16.msra.mxu1 %v3238_v16  ;;  %v500_v16 = vld [vmem:[#allocation4 + $0x40] sm:$0xff] }
 0x272   :  { %2709 = vmatprep.subr.bf16.mxu1 %v3074_v53 }
 0x327   :  { %v615_v9 = vpop.f32.mrb[2].mxu0  ;;  %v686_v14 = vpop.f32.mrb[6].mxu1 }
 0x328   :  { %v690_v15 = vadd.f32 %v615_v9, %v498_v8  ;;  %v617_v21 = vpop.f32.mrb[3].mxu0  ;;  %v2233_v26 = vpop.f32.mrb[7].mxu1  ;;  %v704_v48 = vadd.f32 %v3265_v34, %v686_v14  ;;  %v968_v8 = vld [vmem:[#allocation6 + $0x108] sm:$0xff]  ;;  %v975_v14 = vld [vmem:[#allocation6 + $0x140] sm:$0xff] }
 0x329   :  { %v697_v32 = vadd.f32 %v617_v21, %v499_v20  ;;  %v972_v9 = vld [vmem:[#allocation6 + $0x128] sm:$0xff]  ;;  %v971_v21 = vld [vmem:[#allocation6 + $0x120] sm:$0xff]  ;;  %v974_v26 = vld [vmem:[#allocation6 + $0x138] sm:$0xff] }
 0x32a   :  { %v1956_v27 = vmul.f32 -1.442695, %v690_v15  ;;  %v3401_v15 = vpack.c.bf16 %v968_v8, %v965_v30  ;;  %v3403_v20 = vpack.c.bf16 %v975_v14, %v972_v9  ;;  %v1157_v30 = vld [vmem:[#allocation6 + $0x28] sm:$0xff]  ;;  %v1160_v9 = vld [vmem:[#allocation6 + $0x40] sm:$0xff]  ;;  %v1163_v14 = vld [vmem:[#allocation6 + $0x58] sm:$0xff] }
 0x32b   :  { %v1957_v33 = vmul.f32 -1.442695, %v697_v32  ;;  %v976_v32 = vld [vmem:[#allocation6 + $0x148] sm:$0xff]  ;;  %v3451_v8 = vpack.c.bf16 %v1157_v30, %v1154_v29 }
 0x32c   :  { %2960 = vpow2.f32 %v1956_v27  ;;  %v973_v27 = vld [vmem:[#allocation6 + $0x130] sm:$0xff] }
 0x32d   :  { %2962 = vpow2.f32 %v1957_v33  ;;  %v978_v33 = vld [vmem:[#allocation6 + $0x158] sm:$0xff] }
 0x336   :  { %v2961_v38 = vpop.eup %2960 }
 0x337   :  { %v694_v39 = vadd.f32 1.0, %v2961_v38  ;;  %v2963_v44 = vpop.eup %2962  ;;  %v981_v38 = vld [vmem:[#allocation6 + $0x170] sm:$0xff] }
 0x338   :  { %v701_v45 = vadd.f32 1.0, %v2963_v44  ;;  %v3409_v44 = vpack.c.bf16 %v976_v32, %v973_v27  ;;  %v1169_v27 = vld [vmem:[#allocation6 + $0x88] sm:$0xff] }
 0x339   :  { %2964 = vrcp.f32 %v694_v39  ;;  %v3407_v39 = vpack.c.bf16 %v974_v26, %v971_v21  ;;  %v3455_v21 = vpack.c.bf16 %v1163_v14, %v1160_v9  ;;  %v1166_v26 = vld [vmem:[#allocation6 + $0x70] sm:$0xff] }
 0x33a   :  { %2966 = vrcp.f32 %v701_v45  ;;  %v979_v45 = vld [vmem:[#allocation6 + $0x160] sm:$0xff]  ;;  %v3459_v32 = vpack.c.bf16 %v1169_v27, %v1166_v26  ;;  %v1149_v26 = vld [vmem:[#allocation4 + $0x78] sm:$0xff] }
 0x343   :  { %v2965_v11 = vpop.eup %2964 }
 0x344   :  { %v705_v36 = vmul.f32 %v2965_v11, %v704_v48  ;;  %v2967_v40 = vpop.eup %2966  ;;  %v3412_v48 = vpack.c.bf16 %v981_v38, %v978_v33  ;;  %v977_v11 = vld [vmem:[#allocation6 + $0x150] sm:$0xff]  ;;  %v1172_v33 = vld [vmem:[#allocation6 + $0xa0] sm:$0xff]  ;;  %v1175_v38 = vld [vmem:[#allocation6 + $0xb8] sm:$0xff] }
 0x345   :  { %v708_v41 = vsub.f32 1.0, %v2967_v40  ;;  %v710_v46 = vmul.f32 %v2967_v40, %v3310_v35 }
 0x346   :  { %v706_v37 = vadd.f32 %v705_v36, %v500_v16  ;;  %v980_v16 = vld [vmem:[#allocation6 + $0x168] sm:$0xff]  ;;  %v982_v36 = vld [vmem:[#allocation6 + $0x178] sm:$0xff] }
 0x347   :  { %v3419_v40 = vpack.c.bf16 %v980_v16, %v977_v11  ;;  %v1178_v11 = vld [vmem:[#allocation6 + $0xd0] sm:$0xff]  ;;  %v1181_v16 = vld [vmem:[#allocation6 + $0xe8] sm:$0xff] }
 0x348   :  { %2968 = vtanh.f32 %v706_v37  ;;  %v3415_v37 = vpack.c.bf16 %v982_v36, %v979_v45  ;;  %v3463_v45 = vpack.c.bf16 %v1175_v38, %v1172_v33  ;;  %v3467_v36 = vpack.c.bf16 %v1181_v16, %v1178_v11  ;;  %v1150_v11 = vld [vmem:[#allocation4 + $0x80] sm:$0xff] }
 0x352   :  { %v2969_v42 = vpop.eup %2968 }
 0x353   :  { %v709_v43 = vmul.f32 %v2969_v42, %v708_v41  ;;  %v715_v41 = vld [vmem:[#allocation4 + $0x48] sm:$0xff] }
 0x355   :  { %v3350_v47 = vadd.f32 %v710_v46, %v709_v43 }
 0x357   :  { %831 = vmatmul.mubr.f32.vlgmr.msra.gmra.mrb[4].mxu0 %v3350_v47  ;;  %2267 = vmatmul.mubr.f32.vlgmr.msra.gmra.mrb[8].mxu1 %v3350_v47 }
 0x358   :  { %2711 = vmatpush3.bf16.msra.mxu1 %v3205_v52  ;;  %1047 = vmatprep.mubr.f32.mxu0 %v3073_v0  ;;  %v936_v52 = vld [vmem:[#allocation6 + $0x8] sm:$0xff] }
 0x359   :  { %2712 = vmatprep.subr.bf16.mxu1 %v3074_v53  ;;  %2301 = vmatprep.mubr.msk.f32.mxu1 %vm3075_vm0, %v3073_v0 }
 0x35c   :  { %2714 = vmatpush3.bf16.msra.mxu1 %v3212_v56  ;;  %v939_v56 = vld [vmem:[#allocation6 + $0x20] sm:$0xff] }
 0x35d   :  { %2715 = vmatprep.subr.bf16.mxu1 %v3074_v53  ;;  %v3369_v49 = vpack.c.bf16 %v939_v56, %v936_v52  ;;  %v716_v52 = vld [vmem:[#allocation4 + $0x50] sm:$0xff] }
 0x35f   :  { %2678 = vmatprep.subr.bf16.mxu0 %v3369_v49 }
 0x360   :  { %2717 = vmatpush3.bf16.msra.mxu1 %v3218_v59  ;;  %v938_v59 = vld [vmem:[#allocation6 + $0x18] sm:$0xff] }
 0x361   :  { %2718 = vmatprep.subr.bf16.mxu1 %v3074_v53  ;;  %v3371_v54 = vpack.c.bf16 %v938_v59, %v935_v50 }
 0x363   :  { %2680 = vmatpush1.bf16.msra.mxu0 %v3371_v54 }
 0x364   :  { %2720 = vmatpush3.bf16.msra.mxu1 %v3222_v62  ;;  %v942_v62 = vld [vmem:[#allocation6 + $0x38] sm:$0xff] }
 0x365   :  { %2721 = vmatprep.subr.bf16.mxu1 %v3074_v53 }
 0x368   :  { %2723 = vmatpush3.bf16.msra.mxu1 %v3226_v2  ;;  %v945_v2 = vld [vmem:[#allocation6 + $0x50] sm:$0xff] }
 0x369   :  { %2724 = vmatprep.subr.bf16.mxu1 %v3074_v53  ;;  %v3375_v55 = vpack.c.bf16 %v945_v2, %v942_v62 }
 0x36b   :  { %2682 = vmatprep.subr.bf16.mxu0 %v3375_v55 }
 0x36c   :  { %2726 = vmatpush3.bf16.msra.mxu1 %v3230_v6  ;;  %v944_v6 = vld [vmem:[#allocation6 + $0x48] sm:$0xff] }
 0x36d   :  { %2727 = vmatprep.subr.bf16.mxu1 %v3074_v53  ;;  %v3377_v58 = vpack.c.bf16 %v944_v6, %v941_v51 }
 0x36f   :  { %2684 = vmatpush1.bf16.msra.mxu0 %v3377_v58 }
 0x370   :  { %2686 = vmatprep.subr.bf16.mxu0 %v3381_v63  ;;  %2729 = vmatpush3.bf16.msra.mxu1 %v3409_v44 }
 0x371   :  { %2730 = vmatprep.subr.bf16.mxu1 %v3074_v53 }
 0x373   :  { %2688 = vmatpush1.bf16.msra.mxu0 %v3383_v5 }
 0x374   :  { %2690 = vmatprep.subr.bf16.mxu0 %v3387_v12  ;;  %2732 = vmatpush3.bf16.msra.mxu1 %v3415_v37 }
 0x375   :  { %2765 = vmatprep.subr.bf16.mxu1 %v3074_v53 }
 0x377   :  { %2692 = vmatpush1.bf16.msra.mxu0 %v3389_v18 }
 0x378   :  { %2694 = vmatprep.subr.bf16.mxu0 %v3393_v22 }
 0x37b   :  { %2696 = vmatpush1.bf16.msra.mxu0 %v3395_v25 }
 0x37c   :  { %2698 = vmatprep.subr.bf16.mxu0 %v3399_v31 }
 0x37f   :  { %2700 = vmatpush1.bf16.msra.mxu0 %v3401_v15 }
 0x380   :  { %2702 = vmatprep.subr.bf16.mxu0 %v3403_v20 }
 0x383   :  { %2704 = vmatpush1.bf16.msra.mxu0 %v3407_v39 }
 0x384   :  { %2706 = vmatprep.subr.bf16.mxu0 %v3412_v48 }
 0x387   :  { %2708 = vmatpush1.bf16.msra.mxu0 %v3419_v40 }
 0x388   :  { %2734 = vmatprep.subr.bf16.mxu0 %v3369_v49 }
 0x42a   :  { %v832_v42 = vpop.f32.mrb[4].mxu0  ;;  %v903_v43 = vpop.f32.mrb[8].mxu1 }
 0x42b   :  { %v907_v46 = vadd.f32 %v832_v42, %v715_v41  ;;  %v834_v56 = vpop.f32.mrb[5].mxu0  ;;  %v2268_v50 = vpop.f32.mrb[9].mxu1  ;;  %v921_v1 = vadd.f32 %v3265_v34, %v903_v43  ;;  %v1184_v41 = vld [vmem:[#allocation6 + $0x100] sm:$0xff]  ;;  %v1187_v42 = vld [vmem:[#allocation6 + $0x118] sm:$0xff] }
 0x42c   :  { %v914_v62 = vadd.f32 %v834_v56, %v716_v52  ;;  %v3471_v43 = vpack.c.bf16 %v1187_v42, %v1184_v41 }
 0x42d   :  { %v1958_v59 = vmul.f32 -1.442695, %v907_v46  ;;  %v932_v46 = vld [vmem:[#allocation4 + $0x60] sm:$0xff] }
 0x42e   :  { %v1959_v2 = vmul.f32 -1.442695, %v914_v62 }
 0x42f   :  { %2970 = vpow2.f32 %v1958_v59  ;;  %v933_v59 = vld [vmem:[#allocation4 + $0x68] sm:$0xff] }
 0x430   :  { %2972 = vpow2.f32 %v1959_v2 }
 0x439   :  { %v2971_v51 = vpop.eup %2970 }
 0x43a   :  { %v911_v6 = vadd.f32 1.0, %v2971_v51  ;;  %v2973_v60 = vpop.eup %2972 }
 0x43b   :  { %v918_v61 = vadd.f32 1.0, %v2973_v60 }
 0x43c   :  { %2974 = vrcp.f32 %v911_v6 }
 0x43d   :  { %2976 = vrcp.f32 %v918_v61 }
 0x446   :  { %v2975_v3 = vpop.eup %2974 }
 0x447   :  { %v922_v10 = vmul.f32 %v2975_v3, %v921_v1  ;;  %v2977_v17 = vpop.eup %2976 }
 0x448   :  { %v925_v4 = vsub.f32 1.0, %v2977_v17  ;;  %v927_v24 = vmul.f32 %v2977_v17, %v3350_v47  ;;  %v934_v17 = vld [vmem:[#allocation4 + $0x70] sm:$0xff] }
 0x449   :  { %v923_v13 = vadd.f32 %v922_v10, %v717_v7 }
 0x44b   :  { %2978 = vtanh.f32 %v923_v13 }
 0x455   :  { %v2979_v19 = vpop.eup %2978 }
 0x456   :  { %v926_v23 = vmul.f32 %v2979_v19, %v925_v4 }
 0x458   :  { %v3428_v28 = vadd.f32 %v927_v24, %v926_v23 }
 0x45a   :  { %1048 = vmatmul.mubr.f32.vlgmr.msra.gmra.mrb[6].mxu0 %v3428_v28  ;;  %2302 = vmatmul.mubr.f32.vlgmr.msra.gmra.mrb[10].mxu1 %v3428_v28 }
 0x45b   :  { %2736 = vmatpush1.bf16.msra.mxu0 %v3371_v54  ;;  %1264 = vmatprep.mubr.f32.mxu0 %v3073_v0 }
 0x45c   :  { %2738 = vmatprep.subr.bf16.mxu0 %v3375_v55  ;;  %2336 = vmatprep.mubr.msk.f32.mxu1 %vm3075_vm0, %v3073_v0 }
 0x45d   :  { %2767 = vmatpush3.bf16.msra.mxu1 %v3451_v8 }
 0x45e   :  { %2768 = vmatprep.subr.bf16.mxu1 %v3074_v53 }
 0x45f   :  { %2740 = vmatpush1.bf16.msra.mxu0 %v3377_v58 }
 0x460   :  { %2742 = vmatprep.subr.bf16.mxu0 %v3381_v63 }
 0x461   :  { %2770 = vmatpush3.bf16.msra.mxu1 %v3455_v21 }
 0x462   :  { %2771 = vmatprep.subr.bf16.mxu1 %v3074_v53 }
 0x463   :  { %2744 = vmatpush1.bf16.msra.mxu0 %v3383_v5 }
 0x464   :  { %2746 = vmatprep.subr.bf16.mxu0 %v3387_v12 }
 0x465   :  { %2773 = vmatpush3.bf16.msra.mxu1 %v3459_v32 }
 0x466   :  { %2774 = vmatprep.subr.bf16.mxu1 %v3074_v53 }
 0x467   :  { %2748 = vmatpush1.bf16.msra.mxu0 %v3389_v18 }
 0x468   :  { %2750 = vmatprep.subr.bf16.mxu0 %v3393_v22 }
 0x469   :  { %2776 = vmatpush3.bf16.msra.mxu1 %v3463_v45 }
 0x46a   :  { %2777 = vmatprep.subr.bf16.mxu1 %v3074_v53 }
 0x46b   :  { %2752 = vmatpush1.bf16.msra.mxu0 %v3395_v25 }
 0x46c   :  { %2754 = vmatprep.subr.bf16.mxu0 %v3399_v31 }
 0x46d   :  { %2779 = vmatpush3.bf16.msra.mxu1 %v3467_v36 }
 0x46e   :  { %2780 = vmatprep.subr.bf16.mxu1 %v3074_v53 }
 0x46f   :  { %2756 = vmatpush1.bf16.msra.mxu0 %v3401_v15 }
 0x470   :  { %2758 = vmatprep.subr.bf16.mxu0 %v3403_v20 }
 0x471   :  { %2782 = vmatpush3.bf16.msra.mxu1 %v3471_v43 }
 0x472   :  { %2783 = vmatprep.subr.bf16.mxu1 %v3074_v53 }
 0x473   :  { %2760 = vmatpush1.bf16.msra.mxu0 %v3407_v39 }
 0x474   :  { %2762 = vmatprep.subr.bf16.mxu0 %v3412_v48 }
 0x475   :  { %2785 = vmatpush3.bf16.msra.mxu1 %v3409_v44 }
 0x476   :  { %2786 = vmatprep.subr.bf16.mxu1 %v3074_v53 }
 0x477   :  { %2764 = vmatpush1.bf16.msra.mxu0 %v3419_v40 }
 0x478   :  { %2790 = vmatprep.subr.bf16.mxu0 %v3369_v49 }
 0x479   :  { %2788 = vmatpush3.bf16.msra.mxu1 %v3415_v37 }
 0x47a   :  { %2821 = vmatprep.subr.bf16.mxu1 %v3074_v53 }
 0x52d   :  { %v1049_v52 = vpop.f32.mrb[6].mxu0  ;;  %v1120_v56 = vpop.f32.mrb[10].mxu1 }
 0x52e   :  { %v1124_v50 = vadd.f32 %v1049_v52, %v932_v46  ;;  %v1051_v62 = vpop.f32.mrb[7].mxu0  ;;  %v2303_v2 = vpop.f32.mrb[11].mxu1  ;;  %v1138_v10 = vadd.f32 %v3265_v34, %v1120_v56 }
 0x52f   :  { %v1131_v6 = vadd.f32 %v1051_v62, %v933_v59 }
 0x530   :  { %v1960_v51 = vmul.f32 -1.442695, %v1124_v50 }
 0x531   :  { %v1961_v60 = vmul.f32 -1.442695, %v1131_v6 }
 0x532   :  { %2980 = vpow2.f32 %v1960_v51  ;;  %v1151_v51 = vld [vmem:[#allocation4 + $0x88] sm:$0xff] }
 0x533   :  { %2982 = vpow2.f32 %v1961_v60 }
 0x53c   :  { %v2981_v61 = vpop.eup %2980 }
 0x53d   :  { %v1128_v1 = vadd.f32 1.0, %v2981_v61  ;;  %v2983_v3 = vpop.eup %2982 }
 0x53e   :  { %v1135_v7 = vadd.f32 1.0, %v2983_v3 }
 0x53f   :  { %2984 = vrcp.f32 %v1128_v1 }
 0x540   :  { %2986 = vrcp.f32 %v1135_v7 }
 0x549   :  { %v2985_v13 = vpop.eup %2984 }
 0x54a   :  { %v1139_v4 = vmul.f32 %v2985_v13, %v1138_v10  ;;  %v2987_v23 = vpop.eup %2986 }
 0x54b   :  { %v1142_v24 = vsub.f32 1.0, %v2987_v23  ;;  %v1144_v9 = vmul.f32 %v2987_v23, %v3428_v28 }
 0x54c   :  { %v1140_v19 = vadd.f32 %v1139_v4, %v934_v17  ;;  %v1810_v17 = vld [vmem:[%s3663_s4 + $0x10] sm:$0xff]  ;;  %v1811_v4 = vld [vmem:[%s3663_s4 + $0x18] sm:$0xff] }
 0x54e   :  { %2988 = vtanh.f32 %v1140_v19 }
 0x558   :  { %v2989_v29 = vpop.eup %2988 }
 0x559   :  { %v1143_v30 = vmul.f32 %v2989_v29, %v1142_v24  ;;  %v2905_v24 = vpack.c.bf16 %v1811_v4, %v1810_v17  ;;  %v1812_v29 = vld [vmem:[%s3663_s4 + $0x20] sm:$0xff] }
 0x55b   :  { %v3481_v14 = vadd.f32 %v1144_v9, %v1143_v30  ;;  %v1813_v30 = vld [vmem:[%s3663_s4 + $0x28] sm:$0xff] }
 0x55c   :  { %v2909_v9 = vpack.c.bf16 %v1813_v30, %v1812_v29 }
 0x55d   :  { %1265 = vmatmul.mubr.f32.vlgmr.msra.gmra.mrb[8].mxu0 %v3481_v14  ;;  %2337 = vmatmul.mubr.f32.vlgmr.msra.gmra.mrb[12].mxu1 %v3481_v14 }
 0x55e   :  { %2792 = vmatpush1.bf16.msra.mxu0 %v3371_v54  ;;  %2823 = vmatpush3.bf16.msra.mxu1 %v3451_v8 }
 0x55f   :  { %2794 = vmatprep.subr.bf16.mxu0 %v3375_v55  ;;  %2824 = vmatprep.subr.bf16.mxu1 %v3074_v53 }
 0x560   :  { %1481 = vmatprep.mubr.f32.mxu0 %v3073_v0  ;;  %2371 = vmatprep.mubr.msk.f32.mxu1 %vm3075_vm0, %v3073_v0 }
 0x562   :  { %2796 = vmatpush1.bf16.msra.mxu0 %v3377_v58  ;;  %2826 = vmatpush3.bf16.msra.mxu1 %v3455_v21 }
 0x563   :  { %2798 = vmatprep.subr.bf16.mxu0 %v3381_v63  ;;  %2827 = vmatprep.subr.bf16.mxu1 %v3074_v53 }
 0x566   :  { %2800 = vmatpush1.bf16.msra.mxu0 %v3383_v5  ;;  %2829 = vmatpush3.bf16.msra.mxu1 %v3459_v32 }
 0x567   :  { %2802 = vmatprep.subr.bf16.mxu0 %v3387_v12  ;;  %2830 = vmatprep.subr.bf16.mxu1 %v3074_v53 }
 0x56a   :  { %2804 = vmatpush1.bf16.msra.mxu0 %v3389_v18  ;;  %2832 = vmatpush3.bf16.msra.mxu1 %v3463_v45 }
 0x56b   :  { %2806 = vmatprep.subr.bf16.mxu0 %v3393_v22  ;;  %2833 = vmatprep.subr.bf16.mxu1 %v3074_v53 }
 0x56e   :  { %2808 = vmatpush1.bf16.msra.mxu0 %v3395_v25  ;;  %2835 = vmatpush3.bf16.msra.mxu1 %v3467_v36 }
 0x56f   :  { %2810 = vmatprep.subr.bf16.mxu0 %v3399_v31  ;;  %2836 = vmatprep.subr.bf16.mxu1 %v3074_v53 }
 0x572   :  { %2812 = vmatpush1.bf16.msra.mxu0 %v3401_v15  ;;  %2838 = vmatpush3.bf16.msra.mxu1 %v3471_v43 }
 0x573   :  { %2814 = vmatprep.subr.bf16.mxu0 %v3403_v20  ;;  %2839 = vmatprep.subr.bf16.mxu1 %v3074_v53 }
 0x576   :  { %2816 = vmatpush1.bf16.msra.mxu0 %v3407_v39  ;;  %2841 = vmatpush3.bf16.msra.mxu1 %v3409_v44 }
 0x577   :  { %2818 = vmatprep.subr.bf16.mxu0 %v3412_v48  ;;  %2842 = vmatprep.subr.bf16.mxu1 %v3074_v53 }
 0x57a   :  { %2820 = vmatpush1.bf16.msra.mxu0 %v3419_v40  ;;  %2844 = vmatpush3.bf16.msra.mxu1 %v3415_v37 }
 0x57b   :  { %2846 = vmatprep.subr.bf16.mxu0 %v3369_v49  ;;  %2877 = vmatprep.subr.bf16.mxu1 %v3074_v53 }
 0x630   :  { %v1266_v27 = vpop.f32.mrb[8].mxu0  ;;  %v1337_v33 = vpop.f32.mrb[12].mxu1 }
 0x631   :  { %v1341_v38 = vadd.f32 %v1266_v27, %v1149_v26  ;;  %v1268_v16 = vpop.f32.mrb[9].mxu0  ;;  %v2338_v41 = vpop.f32.mrb[13].mxu1  ;;  %v1355_v49 = vadd.f32 %v3265_v34, %v1337_v33  ;;  %v1814_v26 = vld [vmem:[%s3663_s4 + $0x30] sm:$0xff]  ;;  %v1815_v27 = vld [vmem:[%s3663_s4 + $0x38] sm:$0xff] }
 0x632   :  { %v1348_v46 = vadd.f32 %v1268_v16, %v1150_v11  ;;  %v2913_v33 = vpack.c.bf16 %v1815_v27, %v1814_v26  ;;  %v1818_v16 = vld [vmem:[%s3663_s4 + $0x50] sm:$0xff]  ;;  %v1819_v41 = vld [vmem:[%s3663_s4 + $0x58] sm:$0xff] }
 0x633   :  { %v1962_v42 = vmul.f32 -1.442695, %v1341_v38  ;;  %v1816_v38 = vld [vmem:[%s3663_s4 + $0x40] sm:$0xff] }
 0x634   :  { %v1963_v52 = vmul.f32 -1.442695, %v1348_v46  ;;  %v1820_v46 = vld [vmem:[%s3663_s4 + $0x60] sm:$0xff] }
 0x635   :  { %2990 = vpow2.f32 %v1962_v42  ;;  %v2921_v42 = vpack.c.bf16 %v1819_v41, %v1818_v16 }
 0x636   :  { %2992 = vpow2.f32 %v1963_v52  ;;  %v1821_v52 = vld [vmem:[%s3663_s4 + $0x68] sm:$0xff] }
 0x63f   :  { %v2991_v56 = vpop.eup %2990 }
 0x640   :  { %v1345_v50 = vadd.f32 1.0, %v2991_v56  ;;  %v2993_v59 = vpop.eup %2992  ;;  %v2925_v56 = vpack.c.bf16 %v1821_v52, %v1820_v46 }
 0x641   :  { %v1352_v62 = vadd.f32 1.0, %v2993_v59  ;;  %v1823_v59 = vld [vmem:[%s3663_s4 + $0x78] sm:$0xff] }
 0x642   :  { %2994 = vrcp.f32 %v1345_v50  ;;  %v1822_v50 = vld [vmem:[%s3663_s4 + $0x70] sm:$0xff] }
 0x643   :  { %2996 = vrcp.f32 %v1352_v62  ;;  %v2929_v62 = vpack.c.bf16 %v1823_v59, %v1822_v50 }
 0x64c   :  { %v2995_v2 = vpop.eup %2994 }
 0x64d   :  { %v1356_v6 = vmul.f32 %v2995_v2, %v1355_v49  ;;  %v2997_v61 = vpop.eup %2996  ;;  %v1583_v49 = vld [vmem:[#allocation4 + $0xa8] sm:$0xff] }
 0x64e   :  { %v1359_v1 = vsub.f32 1.0, %v2997_v61  ;;  %v1361_v10 = vmul.f32 %v2997_v61, %v3481_v14 }
 0x64f   :  { %v1357_v60 = vadd.f32 %v1356_v6, %v1151_v51 }
 0x651   :  { %2998 = vtanh.f32 %v1357_v60  ;;  %v1584_v60 = vld [vmem:[#allocation4 + $0xb0] sm:$0xff] }
 0x65b   :  { %v2999_v3 = vpop.eup %2998 }
 0x65c   :  { %v1360_v7 = vmul.f32 %v2999_v3, %v1359_v1 }
 0x65e   :  { %v3522_v13 = vadd.f32 %v1361_v10, %v1360_v7 }
 0x660   :  { %1482 = vmatmul.mubr.f32.vlgmr.msra.gmra.mrb[10].mxu0 %v3522_v13  ;;  %2372 = vmatmul.mubr.f32.vlgmr.msra.gmra.mrb[14].mxu1 %v3522_v13 }
 0x661   :  { %2848 = vmatpush1.bf16.msra.mxu0 %v3371_v54  ;;  %2879 = vmatpush3.bf16.msra.mxu1 %v3451_v8  ;;  %v1809_v54 = vld [vmem:[%s3663_s4 + $0x8] sm:$0xff]  ;;  %v1368_v8 = vld [vmem:[#allocation4 + $0xa0] sm:$0xff] }
 0x662   :  { %2850 = vmatprep.subr.bf16.mxu0 %v3375_v55  ;;  %2880 = vmatprep.subr.bf16.mxu1 %v3074_v53 }
 0x663   :  { %1698 = vmatprep.mubr.f32.mxu0 %v3073_v0  ;;  %2406 = vmatprep.mubr.msk.f32.mxu1 %vm3075_vm0, %v3073_v0  ;;  %v1808_v0 = vld [vmem:[%s3663_s4] sm:$0xff] }
 0x664   :  { %v2901_v55 = vpack.c.bf16 %v1809_v54, %v1808_v0 }
 0x665   :  { %2852 = vmatpush1.bf16.msra.mxu0 %v3377_v58  ;;  %2882 = vmatpush3.bf16.msra.mxu1 %v3455_v21  ;;  %v1366_v58 = vld [vmem:[#allocation4 + $0x90] sm:$0xff] }
 0x666   :  { %2854 = vmatprep.subr.bf16.mxu0 %v3381_v63  ;;  %2883 = vmatprep.subr.bf16.mxu1 %v3074_v53 }
 0x669   :  { %2856 = vmatpush1.bf16.msra.mxu0 %v3383_v5  ;;  %2885 = vmatpush3.bf16.msra.mxu1 %v3459_v32 }
 0x66a   :  { %2858 = vmatprep.subr.bf16.mxu0 %v3387_v12  ;;  %2886 = vmatprep.subr.bf16.mxu1 %v3074_v53 }
 0x66d   :  { %2860 = vmatpush1.bf16.msra.mxu0 %v3389_v18  ;;  %2888 = vmatpush3.bf16.msra.mxu1 %v3463_v45  ;;  %v1367_v18 = vld [vmem:[#allocation4 + $0x98] sm:$0xff] }
 0x66e   :  { %2862 = vmatprep.subr.bf16.mxu0 %v3393_v22  ;;  %2889 = vmatprep.subr.bf16.mxu1 %v3074_v53 }
 0x671   :  { %2864 = vmatpush1.bf16.msra.mxu0 %v3395_v25  ;;  %2891 = vmatpush3.bf16.msra.mxu1 %v3467_v36 }
 0x672   :  { %2866 = vmatprep.subr.bf16.mxu0 %v3399_v31  ;;  %2892 = vmatprep.subr.bf16.mxu1 %v3074_v53 }
 0x675   :  { %2868 = vmatpush1.bf16.msra.mxu0 %v3401_v15  ;;  %2894 = vmatpush3.bf16.msra.mxu1 %v3471_v43 }
 0x676   :  { %2870 = vmatprep.subr.bf16.mxu0 %v3403_v20  ;;  %2895 = vmatprep.subr.bf16.mxu1 %v3074_v53 }
 0x679   :  { %2872 = vmatpush1.bf16.msra.mxu0 %v3407_v39  ;;  %2897 = vmatpush3.bf16.msra.mxu1 %v3409_v44 }
 0x67a   :  { %2874 = vmatprep.subr.bf16.mxu0 %v3412_v48  ;;  %2898 = vmatprep.subr.bf16.mxu1 %v3074_v53 }
 0x67d   :  { %2876 = vmatpush1.bf16.msra.mxu0 %v3419_v40  ;;  %2900 = vmatpush3.bf16.msra.mxu1 %v3415_v37 }
 0x67e   :  { %2902 = vmatprep.subr.bf16.mxu0 %v2901_v55 }
 0x733   :  { %v1483_v63 = vpop.f32.mrb[10].mxu0  ;;  %v1554_v5 = vpop.f32.mrb[14].mxu1 }
 0x734   :  { %v1558_v12 = vadd.f32 %v1483_v63, %v1366_v58  ;;  %v1485_v53 = vpop.f32.mrb[11].mxu0  ;;  %v2373_v22 = vpop.f32.mrb[15].mxu1  ;;  %v1572_v37 = vadd.f32 %v3265_v34, %v1554_v5  ;;  %v1968_v63 = vld [vmem:[%s3664_s5] ss:$0 sm:$0xff] }
 0x735   :  { %v1565_v31 = vadd.f32 %v1485_v53, %v1367_v18 }
 0x736   :  { %v1964_v25 = vmul.f32 -1.442695, %v1558_v12 }
 0x737   :  { %v1965_v15 = vmul.f32 -1.442695, %v1565_v31 }
 0x738   :  { %3000 = vpow2.f32 %v1964_v25 }
 0x739   :  { %3002 = vpow2.f32 %v1965_v15 }
 0x742   :  { %v3001_v20 = vpop.eup %3000 }
 0x743   :  { %v1562_v39 = vadd.f32 1.0, %v3001_v20  ;;  %v3003_v44 = vpop.eup %3002 }
 0x744   :  { %v1569_v48 = vadd.f32 1.0, %v3003_v44 }
 0x745   :  { %3004 = vrcp.f32 %v1562_v39 }
 0x746   :  { %3006 = vrcp.f32 %v1569_v48 }
 0x74f   :  { %v3005_v40 = vpop.eup %3004 }
 0x750   :  { %v1573_v21 = vmul.f32 %v3005_v40, %v1572_v37  ;;  %v3007_v45 = vpop.eup %3006 }
 0x751   :  { %v1576_v36 = vsub.f32 1.0, %v3007_v45  ;;  %v1578_v34 = vmul.f32 %v3007_v45, %v3522_v13 }
 0x752   :  { %v1574_v32 = vadd.f32 %v1573_v21, %v1368_v8 }
 0x754   :  { %3008 = vtanh.f32 %v1574_v32 }
 0x75e   :  { %v3009_v43 = vpop.eup %3008 }
 0x75f   :  { %v1577_v19 = vmul.f32 %v3009_v43, %v1576_v36 }
 0x761   :  { %v3573_v23 = vadd.f32 %v1578_v34, %v1577_v19 }
 0x763   :  { %1699 = vmatmul.mubr.f32.vlgmr.msra.gmra.mrb[12].mxu0 %v3573_v23  ;;  %2407 = vmatmul.mubr.f32.vlgmr.msra.gmra.mrb[16].mxu1 %v3573_v23 }
 0x764   :  { %2904 = vmatpush3.bf16.msra.mxu0 %v2901_v55  ;;  %2441 = vmatprep.mubr.f32.mxu0 %v3269_v57  ;;  %v1817_v57 = vld [vmem:[%s3663_s4 + $0x48] sm:$0xff]  ;;  %v1585_v55 = vld [vmem:[#allocation4 + $0xb8] sm:$0xff] }
 0x765   :  { %2906 = vmatprep.subr.bf16.mxu0 %v2905_v24  ;;  %v2917_v11 = vpack.c.bf16 %v1817_v57, %v1816_v38 }
 0x768   :  { %2908 = vmatpush3.bf16.msra.mxu0 %v2905_v24 }
 0x769   :  { %2910 = vmatprep.subr.bf16.mxu0 %v2909_v9 }
 0x76c   :  { %2912 = vmatpush3.bf16.msra.mxu0 %v2909_v9 }
 0x76d   :  { %2914 = vmatprep.subr.bf16.mxu0 %v2913_v33 }
 0x770   :  { %2916 = vmatpush3.bf16.msra.mxu0 %v2913_v33 }
 0x771   :  { %2918 = vmatprep.subr.bf16.mxu0 %v2917_v11 }
 0x774   :  { %2920 = vmatpush3.bf16.msra.mxu0 %v2917_v11 }
 0x775   :  { %2922 = vmatprep.subr.bf16.mxu0 %v2921_v42 }
 0x778   :  { %2924 = vmatpush3.bf16.msra.mxu0 %v2921_v42 }
 0x779   :  { %2926 = vmatprep.subr.bf16.mxu0 %v2925_v56 }
 0x77c   :  { %2928 = vmatpush3.bf16.msra.mxu0 %v2925_v56 }
 0x77d   :  { %2930 = vmatprep.subr.bf16.mxu0 %v2929_v62 }
 0x780   :  { %2932 = vmatpush3.bf16.msra.mxu0 %v2929_v62 }
 0x783   :  { %2442 = vmatmul.mubr.f32.vlgmr.msra.gmra.mrb[14].mxu0 %v3310_v35 }
 0x784   :  { %2444 = vmatprep.mubr.f32.mxu0 %v3350_v47 }
 0x787   :  { %2445 = vmatmul.mubr.f32.gmra.mrb[16].mxu0 %v3428_v28 }
 0x788   :  { %2447 = vmatprep.mubr.f32.mxu0 %v3481_v14 }
 0x78b   :  { %2448 = vmatmul.mubr.f32.gmra.mrb[18].mxu0 %v3522_v13  ;;  %v3020_v13 = vld [vmem:[%s3662_s3] ss:$0 sm:$0xff] }
 0x78c   :  { %2450 = vmatprep.mubr.f32.mxu0 %v3573_v23 }
 0x836   :  { %v1700_v2 = vpop.f32.mrb[12].mxu0  ;;  %v1771_v51 = vpop.f32.mrb[16].mxu1 }
 0x837   :  { %v1775_v6 = vadd.f32 %v1700_v2, %v1583_v49  ;;  %v1702_v61 = vpop.f32.mrb[13].mxu0  ;;  %v2408_v1 = vpop.f32.mrb[17].mxu1  ;;  %v1789_v0 = vadd.f32 %v3020_v13, %v1771_v51 }
 0x838   :  { %v1782_v7 = vadd.f32 %v1702_v61, %v1584_v60 }
 0x839   :  { %v1966_v3 = vmul.f32 -1.442695, %v1775_v6 }
 0x83a   :  { %v1967_v35 = vmul.f32 -1.442695, %v1782_v7 }
 0x83b   :  { %3010 = vpow2.f32 %v1966_v3 }
 0x83c   :  { %3012 = vpow2.f32 %v1967_v35 }
 0x845   :  { %v3011_v47 = vpop.eup %3010 }
 0x846   :  { %v1779_v28 = vadd.f32 1.0, %v3011_v47  ;;  %v3013_v14 = vpop.eup %3012 }
 0x847   :  { %v1786_v10 = vadd.f32 1.0, %v3013_v14 }
 0x848   :  { %3014 = vrcp.f32 %v1779_v28 }
 0x849   :  { %3016 = vrcp.f32 %v1786_v10 }
 0x852   :  { %v3015_v54 = vpop.eup %3014 }
 0x853   :  { %v1790_v58 = vmul.f32 %v3015_v54, %v1789_v0  ;;  %v3017_v39 = vpop.eup %3016 }
 0x854   :  { %v1793_v8 = vsub.f32 1.0, %v3017_v39  ;;  %v1795_v45 = vmul.f32 %v3017_v39, %v3573_v23 }
 0x855   :  { %v1791_v5 = vadd.f32 %v1790_v58, %v1585_v55 }
 0x856   :  { %v2443_v12 = vpop.f32.mrb[14].mxu0 }
 0x857   :  { %3018 = vtanh.f32 %v1791_v5  ;;  %v1903_v18 = vadd.f32 %v2443_v12, %v1968_v63  ;;  %v1897_v53 = vpop.f32.mrb[15].mxu0 }
 0x858   :  { %v1898_v22 = vadd.f32 %v1968_v63, %v1897_v53 }
 0x859   :  { %1938 = vst.msk [vmem:[%s3665_s6 + $0x8] sm:$0xff] %vm1936_vm1, %v1903_v18 }
 0x85a   :  { %1937 = vst.msk [vmem:[%s3665_s6] sm:$0xff] %vm1936_vm1, %v1898_v22  ;;  %v2446_v25 = vpop.f32.mrb[16].mxu0 }
 0x85b   :  { %v1913_v31 = vadd.f32 %v2446_v25, %v1968_v63  ;;  %v1907_v15 = vpop.f32.mrb[17].mxu0 }
 0x85c   :  { %v1908_v20 = vadd.f32 %v1968_v63, %v1907_v15 }
 0x85d   :  { %1940 = vst.msk [vmem:[%s3665_s6 + $0x18] sm:$0xff] %vm1936_vm1, %v1913_v31 }
 0x85e   :  { %1939 = vst.msk [vmem:[%s3665_s6 + $0x10] sm:$0xff] %vm1936_vm1, %v1908_v20  ;;  %v2449_v44 = vpop.f32.mrb[18].mxu0 }
 0x85f   :  { %v1923_v48 = vadd.f32 %v2449_v44, %v1968_v63  ;;  %v1917_v37 = vpop.f32.mrb[19].mxu0 }
 0x860   :  { %v1918_v40 = vadd.f32 %v1968_v63, %v1917_v37 }
 0x861   :  { %v3019_v21 = vpop.eup %3018  ;;  %1942 = vst.msk [vmem:[%s3665_s6 + $0x28] sm:$0xff] %vm1936_vm1, %v1923_v48 }
 0x862   :  { %1941 = vst.msk [vmem:[%s3665_s6 + $0x20] sm:$0xff] %vm1936_vm1, %v1918_v40  ;;  %v1794_v32 = vmul.f32 %v3019_v21, %v1793_v8 }
 0x864   :  { %v1796_v36 = vadd.f32 %v1795_v45, %v1794_v32 }
 0x866   :  { %2451 = vmatmul.mubr.f32.gmra.mrb[20].mxu0 %v1796_v36 }
 0x939   :  { %v2452_v43 = vpop.f32.mrb[20].mxu0 }
 0x93a   :  { %v1933_v17 = vadd.f32 %v2452_v43, %v1968_v63  ;;  %v1927_v4 = vpop.f32.mrb[21].mxu0 }
 0x93b   :  { %v1928_v19 = vadd.f32 %v1968_v63, %v1927_v4 }
 0x93c   :  { %1944 = vst.msk [vmem:[%s3665_s6 + $0x38] sm:$0xff] %vm1936_vm1, %v1933_v17 }
 0x93d   :  { %1943 = vst.msk [vmem:[%s3665_s6 + $0x30] sm:$0xff] %vm1936_vm1, %v1928_v19 }
 0x93e   :  { %1949 = vsyncpa [#allocation5], 1 }
 0x93f   :  { %1950 = vsyncpa [#allocation7], 1 }

</bundles_post_ra>
